<compile_context>
chip_gen: v6e
topology: v6e:2x2x1
jax: 0.10.0
libtpu: 0.0.40
codegen_flags: <defaults>
</compile_context>

<pallas_src>
import numpy as np
import jax
import jax.numpy as jnp
from jax.experimental import pallas as pl
from jax.experimental.pallas import tpu as pltpu


def fused_rsrp_cnn_kernel(x_ref, w1_ref, b1_ref, w2_ref, b2_ref, wd_ref, bd_ref, o_ref):
    n_narrow, bt = o_ref.shape                 # bt = batch tile (lane axis, multiple of 128)
    l0 = x_ref.shape[1]                        # n_wide_beam (input length)
    l1, l2, l3, l4 = l0 - 1, l0 - 2, l0 - 3, l0 - 4

    # In-kernel layout change (replaces the old wrapper-side whole-input transpose):
    # natural (bt, l0) tile -> one row with column index = l*bt + b.  One small XLU
    # transpose + l0 aligned lane copies per tile; a conv tap shift of +k is then a
    # single aligned lane slice at offset k*bt (no im2col, no per-tap rotations).
    xt = x_ref[...].T                                                     # (l0, bt)
    x = jnp.concatenate([xt[l:l + 1, :] for l in range(l0)], axis=1)      # (1, l0*bt)

    # conv1 (1 -> 32, k=2) + bias + ReLU: rank-1 taps => pure VPU broadcast math (f32).
    w10 = w1_ref[:, 0:1]                                                  # (32, 1)
    w11 = w1_ref[:, 1:2]                                                  # (32, 1)
    y1 = w10 * x[:, :l1 * bt] + w11 * x[:, bt:(l1 + 1) * bt] + b1_ref[...]
    y1 = jnp.maximum(y1, 0.0)                                             # (32, l1*bt)

    # maxpool1d(k=2, s=1): elementwise max of two 128-aligned lane slices (pure VPU).
    p1 = jnp.maximum(y1[:, :l2 * bt], y1[:, bt:(l2 + 1) * bt])            # (32, l2*bt)
    p1b = p1.astype(jnp.bfloat16)

    # conv2 (32 -> 64, k=2) as ONE K=64 MXU dot: stack the two tap slices on sublanes
    # and contract against the pre-concatenated (64, 64) weight (f32 accumulation).
    p1cat = jnp.concatenate([p1b[:, :l3 * bt], p1b[:, bt:(l3 + 1) * bt]], axis=0)   # (64, l3*bt)
    y2 = jnp.dot(w2_ref[...], p1cat, preferred_element_type=jnp.float32)            # (64, l3*bt)
    y2 = jnp.maximum(y2 + b2_ref[...], 0.0)

    p2 = jnp.maximum(y2[:, :l4 * bt], y2[:, bt:(l4 + 1) * bt])            # (64, l4*bt)
    p2b = p2.astype(jnp.bfloat16)

    # dense as ONE deep contraction (K = 64*l4): restack (64, l4*bt) -> (64*l4, bt)
    # with l4 aligned sublane-block copies (row index = l*64 + c); wd is pre-flattened
    # to the matching order.  Logits emitted transposed (n_narrow, bt): lane-dense store.
    p2cat = jnp.concatenate([p2b[:, l * bt:(l + 1) * bt] for l in range(l4)], axis=0)
    o_ref[...] = (jnp.dot(wd_ref[...], p2cat, preferred_element_type=jnp.float32)
                  + bd_ref[...])


def prepare_params(w1, b1, w2, b2, wd, bd, n_wide_beam):
    """Convert torch-layout weights into the kernel layout (bf16 for matmul operands)."""
    l4 = n_wide_beam - 4
    cout2 = w2.shape[0]                              # 64
    n_narrow = wd.shape[0]
    return dict(
        w1m=jnp.asarray(w1[:, 0, :], jnp.float32),                          # (32, 2)
        b1c=jnp.asarray(b1, jnp.float32).reshape(-1, 1),                    # (32, 1)
        # conv2 taps merged along input channels: w2cat[o, k*32 + c] = w2[o, c, k]
        w2cat=jnp.concatenate([w2[:, :, 0], w2[:, :, 1]],
                              axis=1).astype(jnp.bfloat16),                 # (64, 64)
        b2c=jnp.asarray(b2, jnp.float32).reshape(-1, 1),                    # (64, 1)
        # torch flatten order is wd[n, c*l4 + l]; kernel restack uses row = l*64 + c.
        wdflat=jnp.transpose(wd.reshape(n_narrow, cout2, l4), (0, 2, 1))
                  .reshape(n_narrow, l4 * cout2).astype(jnp.bfloat16),      # (Nn, 64*l4)
        bdc=jnp.asarray(bd, jnp.float32).reshape(-1, 1),                    # (Nn, 1)
    )


def _pick_b_tile(B):
    """Batch-tile (lane) width.

    * multiple of 128 (lane-dense, unmasked stores),
    * divisor of the 128-padded batch (no padding beyond 128 granularity),
    * capped at 512 (keeps temporaries well inside v5e's 16 MiB scoped-VMEM default
      and v7x's 64 MiB physical VMEM),
    * >= 2 grid tiles whenever possible so v7x's two TensorCores both get work.
    """
    b128 = -(-B // 128) * 128
    if b128 <= 128:
        return 128
    for cand in (512, 384, 256, 128):
        if cand <= b128 // 2 and b128 % cand == 0:
            return cand
    return 128


def rsrp_cnn_forward(x, params, *, b_tile=None):
    if x.ndim == 3:
        x = x[:, 0, :]                               # (B, 1, L) NCL -> (B, L)
    x = x.astype(jnp.float32)
    B, l0 = x.shape
    n_narrow = params["bdc"].shape[0]
    l4 = l0 - 4

    if b_tile is None:
        b_tile = _pick_b_tile(B)
    n_tiles = -(-B // b_tile)
    b_pad = n_tiles * b_tile

    # No whole-input transpose: feed the natural (B, L) layout, padded on batch only.
    xp = jnp.pad(x, ((0, b_pad - B), (0, 0)))        # (b_pad, l0)

    flops = int(b_pad * (2 * 2 * 1 * 32 * (l0 - 1)          # conv1
                         + 2 * 2 * 32 * 64 * (l0 - 3)       # conv2
                         + 2 * 64 * l4 * n_narrow))         # dense
    weight_bytes = sum(int(v.size) * v.dtype.itemsize for v in params.values())
    bytes_accessed = int(4 * b_pad * l0 + 4 * n_narrow * b_pad + weight_bytes)

    out_t = pl.pallas_call(
        fused_rsrp_cnn_kernel,
        out_shape=jax.ShapeDtypeStruct((n_narrow, b_pad), jnp.float32),
        grid=(n_tiles,),
        in_specs=[
            pl.BlockSpec((b_tile, l0), lambda t: (t, 0)),
            pl.BlockSpec(params["w1m"].shape, lambda t: (0, 0)),
            pl.BlockSpec(params["b1c"].shape, lambda t: (0, 0)),
            pl.BlockSpec(params["w2cat"].shape, lambda t: (0, 0)),
            pl.BlockSpec(params["b2c"].shape, lambda t: (0, 0)),
            pl.BlockSpec(params["wdflat"].shape, lambda t: (0, 0)),
            pl.BlockSpec(params["bdc"].shape, lambda t: (0, 0)),
        ],
        out_specs=pl.BlockSpec((n_narrow, b_tile), lambda t: (0, t)),
        compiler_params=pltpu.CompilerParams(
            dimension_semantics=("parallel",),
            vmem_limit_bytes=32 * 1024 * 1024,
        ),
        cost_estimate=pl.CostEstimate(flops=flops, transcendentals=0,
                                      bytes_accessed=bytes_accessed),
    )(xp, params["w1m"], params["b1c"], params["w2cat"], params["b2c"],
      params["wdflat"], params["bdc"])

    return out_t.T[:B]                               # (B, n_narrow), strip batch padding


def reference_forward(x, w1, b1, w2, b2, wd, bd):
    """Exact f32 reference of the torch module's forward."""
    def conv1d(h, w, bias):
        K = w.shape[2]
        lout = h.shape[2] - K + 1
        y = sum(jnp.einsum("bcl,oc->bol", h[:, :, k:k + lout], w[:, :, k]) for k in range(K))
        return y + bias[None, :, None]

    h = jnp.maximum(conv1d(x, w1, b1), 0.0)
    h = jnp.maximum(h[:, :, :-1], h[:, :, 1:])       # MaxPool1d(k=2, s=1)
    h = jnp.maximum(conv1d(h, w2, b2), 0.0)
    h = jnp.maximum(h[:, :, :-1], h[:, :, 1:])
    flat = h.reshape(h.shape[0], -1)                 # torch.flatten(x, 1): channel-major
    return flat @ wd.T + bd


if __name__ == "__main__":
    n_wide_beam, n_narrow_beam = 16, 8
    B = 4

    key = jax.random.PRNGKey(0)
    kx, k1, k2, k3, k4, k5, k6, kx2 = jax.random.split(key, 8)

    x = jax.random.normal(kx, (B, 1, n_wide_beam), jnp.float32)

    l4 = n_wide_beam - 4
    flat_dim = 64 * l4
    w1 = 0.10 * jax.random.normal(k1, (32, 1, 2), jnp.float32)
    b1 = 0.01 * jax.random.normal(k2, (32,), jnp.float32)
    w2 = 0.10 * jax.random.normal(k3, (64, 32, 2), jnp.float32)
    b2 = 0.01 * jax.random.normal(k4, (64,), jnp.float32)
    wd = 0.05 * jax.random.normal(k5, (n_narrow_beam, flat_dim), jnp.float32)
    bd = 0.01 * jax.random.normal(k6, (n_narrow_beam,), jnp.float32)

    params = prepare_params(w1, b1, w2, b2, wd, bd, n_wide_beam)

    # Small-batch check (single 128-wide tile).
    out = jax.block_until_ready(rsrp_cnn_forward(x, params))
    ref = reference_forward(x, w1, b1, w2, b2, wd, bd)
    assert out.shape == (B, n_narrow_beam)
    # bf16 matmul operands (f32 accumulation) => slightly relaxed tolerance vs pure-f32 ref.
    np.testing.assert_allclose(np.asarray(out), np.asarray(ref), rtol=2e-2, atol=3e-2)

    # Multi-tile check: exercises the 128-granularity tiling / padding / >=2-tile path.
    B2 = 260
    x2 = jax.random.normal(kx2, (B2, 1, n_wide_beam), jnp.float32)
    out2 = jax.block_until_ready(rsrp_cnn_forward(x2, params))
    ref2 = reference_forward(x2, w1, b1, w2, b2, wd, bd)
    assert out2.shape == (B2, n_narrow_beam)
    np.testing.assert_allclose(np.asarray(out2), np.asarray(ref2), rtol=2e-2, atol=3e-2)

    print("KERNEL_OK")
</pallas_src>

<mosaic_0001>
module attributes {stable_mosaic.version = 11 : i64} {
  func.func @fused_rsrp_cnn_kernel(%arg0: i32, %arg1: memref<128x16xf32, #tpu.memory_space<vmem>>, %arg2: memref<32x2xf32, #tpu.memory_space<vmem>>, %arg3: memref<32x1xf32, #tpu.memory_space<vmem>>, %arg4: memref<64x64xbf16, #tpu.memory_space<vmem>>, %arg5: memref<64x1xf32, #tpu.memory_space<vmem>>, %arg6: memref<8x768xbf16, #tpu.memory_space<vmem>>, %arg7: memref<8x1xf32, #tpu.memory_space<vmem>>, %arg8: memref<8x128xf32, #tpu.memory_space<vmem>>) attributes {dimension_semantics = [#tpu.dimension_semantics<parallel>], iteration_bounds = array<i64: 1>, scalar_prefetch = 0 : i64, scratch_operands = 0 : i64, tpu.core_type = #tpu.core_type<tc>, window_params = [{transform_indices = @transform_0, window_bounds = array<i64: 128, 16>}, {pipeline_mode = #tpu.pipeline_mode<synchronous>, transform_indices = @transform_1, window_bounds = array<i64: 32, 2>}, {pipeline_mode = #tpu.pipeline_mode<synchronous>, transform_indices = @transform_2, window_bounds = array<i64: 32, 1>}, {pipeline_mode = #tpu.pipeline_mode<synchronous>, transform_indices = @transform_3, window_bounds = array<i64: 64, 64>}, {pipeline_mode = #tpu.pipeline_mode<synchronous>, transform_indices = @transform_4, window_bounds = array<i64: 64, 1>}, {pipeline_mode = #tpu.pipeline_mode<synchronous>, transform_indices = @transform_5, window_bounds = array<i64: 8, 768>}, {pipeline_mode = #tpu.pipeline_mode<synchronous>, transform_indices = @transform_6, window_bounds = array<i64: 8, 1>}, {transform_indices = @transform_7, window_bounds = array<i64: 8, 128>}]} {
    %c0 = arith.constant 0 : index
    %c0_0 = arith.constant 0 : index
    %0 = vector.load %arg1[%c0, %c0_0] : memref<128x16xf32, #tpu.memory_space<vmem>>, vector<128x16xf32>
    %1 = tpu.transpose %0, [1, 0] : vector<128x16xf32> -> vector<16x128xf32>
    %2 = vector.extract_strided_slice %1 {offsets = [0, 0], sizes = [1, 128], strides = [1, 1]} : vector<16x128xf32> to vector<1x128xf32>
    %3 = vector.extract_strided_slice %1 {offsets = [1, 0], sizes = [1, 128], strides = [1, 1]} : vector<16x128xf32> to vector<1x128xf32>
    %4 = vector.extract_strided_slice %1 {offsets = [2, 0], sizes = [1, 128], strides = [1, 1]} : vector<16x128xf32> to vector<1x128xf32>
    %5 = vector.extract_strided_slice %1 {offsets = [3, 0], sizes = [1, 128], strides = [1, 1]} : vector<16x128xf32> to vector<1x128xf32>
    %6 = vector.extract_strided_slice %1 {offsets = [4, 0], sizes = [1, 128], strides = [1, 1]} : vector<16x128xf32> to vector<1x128xf32>
    %7 = vector.extract_strided_slice %1 {offsets = [5, 0], sizes = [1, 128], strides = [1, 1]} : vector<16x128xf32> to vector<1x128xf32>
    %8 = vector.extract_strided_slice %1 {offsets = [6, 0], sizes = [1, 128], strides = [1, 1]} : vector<16x128xf32> to vector<1x128xf32>
    %9 = vector.extract_strided_slice %1 {offsets = [7, 0], sizes = [1, 128], strides = [1, 1]} : vector<16x128xf32> to vector<1x128xf32>
    %10 = vector.extract_strided_slice %1 {offsets = [8, 0], sizes = [1, 128], strides = [1, 1]} : vector<16x128xf32> to vector<1x128xf32>
    %11 = vector.extract_strided_slice %1 {offsets = [9, 0], sizes = [1, 128], strides = [1, 1]} : vector<16x128xf32> to vector<1x128xf32>
    %12 = vector.extract_strided_slice %1 {offsets = [10, 0], sizes = [1, 128], strides = [1, 1]} : vector<16x128xf32> to vector<1x128xf32>
    %13 = vector.extract_strided_slice %1 {offsets = [11, 0], sizes = [1, 128], strides = [1, 1]} : vector<16x128xf32> to vector<1x128xf32>
    %14 = vector.extract_strided_slice %1 {offsets = [12, 0], sizes = [1, 128], strides = [1, 1]} : vector<16x128xf32> to vector<1x128xf32>
    %15 = vector.extract_strided_slice %1 {offsets = [13, 0], sizes = [1, 128], strides = [1, 1]} : vector<16x128xf32> to vector<1x128xf32>
    %16 = vector.extract_strided_slice %1 {offsets = [14, 0], sizes = [1, 128], strides = [1, 1]} : vector<16x128xf32> to vector<1x128xf32>
    %17 = vector.extract_strided_slice %1 {offsets = [15, 0], sizes = [1, 128], strides = [1, 1]} : vector<16x128xf32> to vector<1x128xf32>
    %18 = tpu.concatenate %2, %3, %4, %5, %6, %7, %8, %9, %10, %11, %12, %13, %14, %15, %16, %17 in 1 : vector<1x128xf32>, vector<1x128xf32>, vector<1x128xf32>, vector<1x128xf32>, vector<1x128xf32>, vector<1x128xf32>, vector<1x128xf32>, vector<1x128xf32>, vector<1x128xf32>, vector<1x128xf32>, vector<1x128xf32>, vector<1x128xf32>, vector<1x128xf32>, vector<1x128xf32>, vector<1x128xf32>, vector<1x128xf32> -> vector<1x2048xf32>
    %c0_1 = arith.constant 0 : index
    %c0_2 = arith.constant 0 : index
    %19 = vector.load %arg2[%c0_1, %c0_2] : memref<32x2xf32, #tpu.memory_space<vmem>>, vector<32x1xf32>
    %c0_3 = arith.constant 0 : index
    %c1 = arith.constant 1 : index
    %20 = vector.load %arg2[%c0_3, %c1] : memref<32x2xf32, #tpu.memory_space<vmem>>, vector<32x1xf32>
    %21 = vector.extract_strided_slice %18 {offsets = [0, 0], sizes = [1, 1920], strides = [1, 1]} : vector<1x2048xf32> to vector<1x1920xf32>
    %22 = vector.broadcast %19 : vector<32x1xf32> to vector<32x1920xf32>
    %23 = vector.broadcast %21 : vector<1x1920xf32> to vector<32x1920xf32>
    %24 = arith.mulf %22, %23 : vector<32x1920xf32>
    %25 = vector.extract_strided_slice %18 {offsets = [0, 128], sizes = [1, 1920], strides = [1, 1]} : vector<1x2048xf32> to vector<1x1920xf32>
    %26 = vector.broadcast %20 : vector<32x1xf32> to vector<32x1920xf32>
    %27 = vector.broadcast %25 : vector<1x1920xf32> to vector<32x1920xf32>
    %28 = arith.mulf %26, %27 : vector<32x1920xf32>
    %29 = arith.addf %24, %28 : vector<32x1920xf32>
    %c0_4 = arith.constant 0 : index
    %c0_5 = arith.constant 0 : index
    %30 = vector.load %arg3[%c0_4, %c0_5] : memref<32x1xf32, #tpu.memory_space<vmem>>, vector<32x1xf32>
    %31 = vector.broadcast %30 : vector<32x1xf32> to vector<32x1920xf32>
    %32 = arith.addf %29, %31 : vector<32x1920xf32>
    %cst = arith.constant 0.000000e+00 : f32
    %33 = vector.broadcast %cst : f32 to vector<32x1920xf32>
    %34 = arith.maximumf %32, %33 : vector<32x1920xf32>
    %35 = vector.extract_strided_slice %34 {offsets = [0, 0], sizes = [32, 1792], strides = [1, 1]} : vector<32x1920xf32> to vector<32x1792xf32>
    %36 = vector.extract_strided_slice %34 {offsets = [0, 128], sizes = [32, 1792], strides = [1, 1]} : vector<32x1920xf32> to vector<32x1792xf32>
    %37 = arith.maximumf %35, %36 : vector<32x1792xf32>
    %38 = arith.truncf %37 : vector<32x1792xf32> to vector<32x1792xbf16>
    %39 = vector.extract_strided_slice %38 {offsets = [0, 0], sizes = [32, 1664], strides = [1, 1]} : vector<32x1792xbf16> to vector<32x1664xbf16>
    %40 = vector.extract_strided_slice %38 {offsets = [0, 128], sizes = [32, 1664], strides = [1, 1]} : vector<32x1792xbf16> to vector<32x1664xbf16>
    %41 = tpu.concatenate %39, %40 in 0 : vector<32x1664xbf16>, vector<32x1664xbf16> -> vector<64x1664xbf16>
    %c0_6 = arith.constant 0 : index
    %c0_7 = arith.constant 0 : index
    %42 = vector.load %arg4[%c0_6, %c0_7] : memref<64x64xbf16, #tpu.memory_space<vmem>>, vector<64x64xbf16>
    %cst_8 = arith.constant dense<0.000000e+00> : vector<64x1664xf32>
    %43 = tpu.matmul %42, %41, %cst_8 {dimension_numbers = #tpu.dot_dimension_numbers<[1], [0], [0], [1], [0, 0, 1, 1], [], []>} : vector<64x64xbf16>, vector<64x1664xbf16>, vector<64x1664xf32> -> vector<64x1664xf32>
    %c0_9 = arith.constant 0 : index
    %c0_10 = arith.constant 0 : index
    %44 = vector.load %arg5[%c0_9, %c0_10] : memref<64x1xf32, #tpu.memory_space<vmem>>, vector<64x1xf32>
    %45 = vector.broadcast %44 : vector<64x1xf32> to vector<64x1664xf32>
    %46 = arith.addf %43, %45 : vector<64x1664xf32>
    %cst_11 = arith.constant 0.000000e+00 : f32
    %47 = vector.broadcast %cst_11 : f32 to vector<64x1664xf32>
    %48 = arith.maximumf %46, %47 : vector<64x1664xf32>
    %49 = vector.extract_strided_slice %48 {offsets = [0, 0], sizes = [64, 1536], strides = [1, 1]} : vector<64x1664xf32> to vector<64x1536xf32>
    %50 = vector.extract_strided_slice %48 {offsets = [0, 128], sizes = [64, 1536], strides = [1, 1]} : vector<64x1664xf32> to vector<64x1536xf32>
    %51 = arith.maximumf %49, %50 : vector<64x1536xf32>
    %52 = arith.truncf %51 : vector<64x1536xf32> to vector<64x1536xbf16>
    %53 = vector.extract_strided_slice %52 {offsets = [0, 0], sizes = [64, 128], strides = [1, 1]} : vector<64x1536xbf16> to vector<64x128xbf16>
    %54 = vector.extract_strided_slice %52 {offsets = [0, 128], sizes = [64, 128], strides = [1, 1]} : vector<64x1536xbf16> to vector<64x128xbf16>
    %55 = vector.extract_strided_slice %52 {offsets = [0, 256], sizes = [64, 128], strides = [1, 1]} : vector<64x1536xbf16> to vector<64x128xbf16>
    %56 = vector.extract_strided_slice %52 {offsets = [0, 384], sizes = [64, 128], strides = [1, 1]} : vector<64x1536xbf16> to vector<64x128xbf16>
    %57 = vector.extract_strided_slice %52 {offsets = [0, 512], sizes = [64, 128], strides = [1, 1]} : vector<64x1536xbf16> to vector<64x128xbf16>
    %58 = vector.extract_strided_slice %52 {offsets = [0, 640], sizes = [64, 128], strides = [1, 1]} : vector<64x1536xbf16> to vector<64x128xbf16>
    %59 = vector.extract_strided_slice %52 {offsets = [0, 768], sizes = [64, 128], strides = [1, 1]} : vector<64x1536xbf16> to vector<64x128xbf16>
    %60 = vector.extract_strided_slice %52 {offsets = [0, 896], sizes = [64, 128], strides = [1, 1]} : vector<64x1536xbf16> to vector<64x128xbf16>
    %61 = vector.extract_strided_slice %52 {offsets = [0, 1024], sizes = [64, 128], strides = [1, 1]} : vector<64x1536xbf16> to vector<64x128xbf16>
    %62 = vector.extract_strided_slice %52 {offsets = [0, 1152], sizes = [64, 128], strides = [1, 1]} : vector<64x1536xbf16> to vector<64x128xbf16>
    %63 = vector.extract_strided_slice %52 {offsets = [0, 1280], sizes = [64, 128], strides = [1, 1]} : vector<64x1536xbf16> to vector<64x128xbf16>
    %64 = vector.extract_strided_slice %52 {offsets = [0, 1408], sizes = [64, 128], strides = [1, 1]} : vector<64x1536xbf16> to vector<64x128xbf16>
    %65 = tpu.concatenate %53, %54, %55, %56, %57, %58, %59, %60, %61, %62, %63, %64 in 0 : vector<64x128xbf16>, vector<64x128xbf16>, vector<64x128xbf16>, vector<64x128xbf16>, vector<64x128xbf16>, vector<64x128xbf16>, vector<64x128xbf16>, vector<64x128xbf16>, vector<64x128xbf16>, vector<64x128xbf16>, vector<64x128xbf16>, vector<64x128xbf16> -> vector<768x128xbf16>
    %c0_12 = arith.constant 0 : index
    %c0_13 = arith.constant 0 : index
    %66 = vector.load %arg6[%c0_12, %c0_13] : memref<8x768xbf16, #tpu.memory_space<vmem>>, vector<8x768xbf16>
    %cst_14 = arith.constant dense<0.000000e+00> : vector<8x128xf32>
    %67 = tpu.matmul %66, %65, %cst_14 {dimension_numbers = #tpu.dot_dimension_numbers<[1], [0], [0], [1], [0, 0, 1, 1], [], []>} : vector<8x768xbf16>, vector<768x128xbf16>, vector<8x128xf32> -> vector<8x128xf32>
    %c0_15 = arith.constant 0 : index
    %c0_16 = arith.constant 0 : index
    %68 = vector.load %arg7[%c0_15, %c0_16] : memref<8x1xf32, #tpu.memory_space<vmem>>, vector<8x1xf32>
    %69 = vector.broadcast %68 : vector<8x1xf32> to vector<8x128xf32>
    %70 = arith.addf %67, %69 : vector<8x128xf32>
    %c0_17 = arith.constant 0 : index
    %c0_18 = arith.constant 0 : index
    %71 = vector.load %arg8[%c0_17, %c0_18] : memref<8x128xf32, #tpu.memory_space<vmem>>, vector<8x128xf32>
    tpu.vector_store %arg8[%c0_17, %c0_18], %70 {strides = array<i32>} : memref<8x128xf32, #tpu.memory_space<vmem>>, vector<8x128xf32>,
    return
  }
  func.func @transform_0(%arg0: i32) -> (i32, i32) {
    %c0_i32 = arith.constant 0 : i32
    %c0_i32_0 = arith.constant 0 : i32
    return %arg0, %c0_i32 : i32, i32
  }
  func.func @transform_1(%arg0: i32) -> (i32, i32) {
    %c0_i32 = arith.constant 0 : i32
    %c0_i32_0 = arith.constant 0 : i32
    %c0_i32_1 = arith.constant 0 : i32
    return %c0_i32, %c0_i32_0 : i32, i32
  }
  func.func @transform_2(%arg0: i32) -> (i32, i32) {
    %c0_i32 = arith.constant 0 : i32
    %c0_i32_0 = arith.constant 0 : i32
    %c0_i32_1 = arith.constant 0 : i32
    return %c0_i32, %c0_i32_0 : i32, i32
  }
  func.func @transform_3(%arg0: i32) -> (i32, i32) {
    %c0_i32 = arith.constant 0 : i32
    %c0_i32_0 = arith.constant 0 : i32
    %c0_i32_1 = arith.constant 0 : i32
    return %c0_i32, %c0_i32_0 : i32, i32
  }
  func.func @transform_4(%arg0: i32) -> (i32, i32) {
    %c0_i32 = arith.constant 0 : i32
    %c0_i32_0 = arith.constant 0 : i32
    %c0_i32_1 = arith.constant 0 : i32
    return %c0_i32, %c0_i32_0 : i32, i32
  }
  func.func @transform_5(%arg0: i32) -> (i32, i32) {
    %c0_i32 = arith.constant 0 : i32
    %c0_i32_0 = arith.constant 0 : i32
    %c0_i32_1 = arith.constant 0 : i32
    return %c0_i32, %c0_i32_0 : i32, i32
  }
  func.func @transform_6(%arg0: i32) -> (i32, i32) {
    %c0_i32 = arith.constant 0 : i32
    %c0_i32_0 = arith.constant 0 : i32
    %c0_i32_1 = arith.constant 0 : i32
    return %c0_i32, %c0_i32_0 : i32, i32
  }
  func.func @transform_7(%arg0: i32) -> (i32, i32) {
    %c0_i32 = arith.constant 0 : i32
    %c0_i32_0 = arith.constant 0 : i32
    return %c0_i32, %arg0 : i32, i32
  }
}

</mosaic_0001>

<bundles_post_ra>
// kernel: tpu_custom_call.1
= control target key start
LH: loop header
LB: loop body
LE: loop exit
PB: predicated region body
PF: predicated region fallthrough
CT: control target
= control target key end

     0   :  { %v1792_v2 = vmov 1   ;;  %v3518_v4 = vmov 0   ;;  %s3510_s0 = inlined_call_operand.vmem [shape: f32[128,16], index: 0, kind: input, shape index: {}]   ;;  %s3511_s1 = inlined_call_operand.vmem [shape: f32[32,2], index: 1, kind: input, shape index: {}]   ;;  %s3512_s2 = inlined_call_operand.vmem [shape: f32[32,1], index: 2, kind: input, shape index: {}]   ;;  %s3513_s3 = inlined_call_operand.vmem [shape: bf16[64,64], index: 3, kind: input, shape index: {}]   ;;  %s3514_s4 = inlined_call_operand.vmem [shape: f32[64,1], index: 4, kind: input, shape index: {}]   ;;  %s3515_s5 = inlined_call_operand.vmem [shape: bf16[8,768], index: 5, kind: input, shape index: {}]   ;;  %s3516_s6 = inlined_call_operand.vmem [shape: f32[8,1], index: 6, kind: input, shape index: {}]   ;;  %s3517_s7 = inlined_call_operand.hbm [shape: f32[8,128], index: 7, kind: output, shape index: {}]  }
   0x1   :  { %v108_v0 = vld [vmem:[%s3511_s1 + $0x10] sm:$0xff]  ;;  %v106_v1 = vld [vmem:[%s3511_s1] sm:$0xff]  ;;  %1756 = vset.pattern.permute.xlu0 %v1792_v2  ;;  %1754 = vset.pattern.permute.xlu1 %v1792_v2  ;;  %v109_v3 = vld [vmem:[%s3511_s1 + $0x18] sm:$0xff] }
   0x2   :  { %259 = vperm.xlu1 %1754, %v108_v0   ;;  %251 = vperm.xlu0 %1756, %v106_v1   ;;  %v107_v5 = vld [vmem:[%s3511_s1 + $0x8] sm:$0xff] }
   0x3   :  { %739 = vmatprep.mubr.bf16.mxu0 %v3518_v4  ;;  %812 = vmatprep.mubr.bf16.mxu1 %v3518_v4 }
   0x6   :  { %263 = vperm.xlu1 %1754, %v109_v3   ;;  %1757 = vset.pattern.permute.xlu0 %v3518_v4 }
   0x7   :  { %122 = vperm.xlu0 %1757, %v108_v0  }
   0xa   :  { %1755 = vset.pattern.permute.xlu1 %v3518_v4 }
   0xb   :  { %117 = vperm.xlu1 %1755, %v107_v5   ;;  %127 = vperm.xlu0 %1757, %v109_v3  }
   0xc   :  { %12 = vsyncpa [#allocation3], 0  ;;  %v393_v6 = vld [vmem:[%s3512_s2 + $0x18] sm:$0xff]  ;;  %v392_v7 = vld [vmem:[%s3512_s2 + $0x10] sm:$0xff]  ;;  %v130_v40 = vlaneseq  ;;  %vm694_vm0 = vcmask 523264  }
   0xd   :  { %v390_v8 = vld [vmem:[%s3512_s2] sm:$0xff]  ;;  %v391_v9 = vld [vmem:[%s3512_s2 + $0x8] sm:$0xff]  ;;  %v632_v10 = vld [vmem:[%s3514_s4 + $0x30] sm:$0xff] }
   0xe   :  { %v633_v11 = vld [vmem:[%s3514_s4 + $0x38] sm:$0xff]  ;;  %v630_v12 = vld [vmem:[%s3514_s4 + $0x20] sm:$0xff]  ;;  %v631_v13 = vld [vmem:[%s3514_s4 + $0x28] sm:$0xff]  ;;  %v131_v42 = vshrl.u32 %v130_v40, 7 }
   0xf   :  { %1758 = vset.pattern.permute.xlu1 %v1792_v2  ;;  %112 = vperm.xlu0 %1757, %v106_v1   ;;  %v628_v14 = vld [vmem:[%s3514_s4 + $0x10] sm:$0xff]  ;;  %v28_v15 = vld [vmem:[%s3510_s0] sm:$0xff]  ;;  %v629_v16 = vld [vmem:[%s3514_s4 + $0x18] sm:$0xff] }
  0x10   :  { %255 = vperm.xlu1 %1758, %v107_v5   ;;  %v29_v17 = vld [vmem:[%s3510_s0 + $0x8] sm:$0xff]  ;;  %v626_v18 = vld [vmem:[%s3514_s4] sm:$0xff]  ;;  %v30_v19 = vld [vmem:[%s3510_s0 + $0x10] sm:$0xff]  ;;  %v132_v44 = vsub.s32 0, %v131_v42 }
  0x11   :  { %v627_v20 = vld [vmem:[%s3514_s4 + $0x8] sm:$0xff]  ;;  %v31_v21 = vld [vmem:[%s3510_s0 + $0x18] sm:$0xff]  ;;  %v1461_v22 = vld [vmem:[%s3516_s6] sm:$0xff] }
  0x12   :  { %v32_v23 = vld [vmem:[%s3510_s0 + $0x20] sm:$0xff]  ;;  %v33_v24 = vld [vmem:[%s3510_s0 + $0x28] sm:$0xff]  ;;  %v34_v25 = vld [vmem:[%s3510_s0 + $0x30] sm:$0xff] }
  0x13   :  { %411 = vperm.xlu0 %1757, %v393_v6   ;;  %v35_v26 = vld [vmem:[%s3510_s0 + $0x38] sm:$0xff]  ;;  %v36_v27 = vld [vmem:[%s3510_s0 + $0x40] sm:$0xff]  ;;  %v37_v28 = vld [vmem:[%s3510_s0 + $0x48] sm:$0xff] }
  0x14   :  { %1759 = vset.pattern.permute.xlu1 %v3518_v4  ;;  %v38_v29 = vld [vmem:[%s3510_s0 + $0x50] sm:$0xff]  ;;  %v39_v30 = vld [vmem:[%s3510_s0 + $0x58] sm:$0xff]  ;;  %v40_v31 = vld [vmem:[%s3510_s0 + $0x60] sm:$0xff] }
  0x15   :  { %406 = vperm.xlu1 %1759, %v392_v7   ;;  %v41_v32 = vld [vmem:[%s3510_s0 + $0x68] sm:$0xff]  ;;  %v42_v33 = vld [vmem:[%s3510_s0 + $0x70] sm:$0xff]  ;;  %v43_v34 = vld [vmem:[%s3510_s0 + $0x78] sm:$0xff] }
  0x19   :  { %396 = vperm.xlu1 %1759, %v390_v8  }
  0x1d   :  { %401 = vperm.xlu1 %1759, %v391_v9  }
  0x21   :  { %666 = vperm.xlu1 %1759, %v632_v10  }
  0x25   :  { %671 = vperm.xlu1 %1759, %v633_v11  }
  0x29   :  { %656 = vperm.xlu1 %1759, %v630_v12  }
  0x2d   :  { %661 = vperm.xlu1 %1759, %v631_v13  }
  0x31   :  { %646 = vperm.xlu1 %1759, %v628_v14   ;;  %44 = vxpose.xlu0.b32.start [1/16] (narrow) %v28_v15, 16 }
  0x35   :  { %651 = vperm.xlu1 %1759, %v629_v16   ;;  %45 = vxpose.xlu0.b32.cont [2/16] (narrow) %v29_v17, 16 }
  0x39   :  { %636 = vperm.xlu1 %1759, %v626_v18   ;;  %46 = vxpose.xlu0.b32.cont [3/16] (narrow) %v30_v19, 16 }
  0x3d   :  { %641 = vperm.xlu1 %1759, %v627_v20   ;;  %47 = vxpose.xlu0.b32.cont [4/16] (narrow) %v31_v21, 16 }
  0x41   :  { %1464 = vperm.xlu1 %1759, %v1461_v22   ;;  %48 = vxpose.xlu0.b32.cont [5/16] (narrow) %v32_v23, 16 }
  0x45   :  { %49 = vxpose.xlu0.b32.cont [6/16] (narrow) %v33_v24, 16 }
  0x49   :  { %50 = vxpose.xlu0.b32.cont [7/16] (narrow) %v34_v25, 16 }
  0x4d   :  { %51 = vxpose.xlu0.b32.cont [8/16] (narrow) %v35_v26, 16 }
  0x51   :  { %52 = vxpose.xlu0.b32.cont [9/16] (narrow) %v36_v27, 16 }
  0x55   :  { %53 = vxpose.xlu0.b32.cont [10/16] (narrow) %v37_v28, 16 }
  0x59   :  { %54 = vxpose.xlu0.b32.cont [11/16] (narrow) %v38_v29, 16 }
  0x5d   :  { %55 = vxpose.xlu0.b32.cont [12/16] (narrow) %v39_v30, 16 }
  0x61   :  { %56 = vxpose.xlu0.b32.cont [13/16] (narrow) %v40_v31, 16 }
  0x65   :  { %57 = vxpose.xlu0.b32.cont [14/16] (narrow) %v41_v32, 16 }
  0x69   :  { %58 = vxpose.xlu0.b32.cont [15/16] (narrow) %v42_v33, 16 }
  0x6d   :  { %59 = vxpose.xlu0.b32.end [16/16] (narrow) %v43_v34, 16 }
  0x7d   :  { %v1939_v35 = vpop.permute.xlu0 %251  ;;  %v1945_v38 = vpop.permute.xlu1 %259 }
  0x81   :  { %v1949_v41 = vpop.permute.xlu1 %263 }
  0x82   :  { %v1941_v36 = vpop.permute.xlu0 %122 }
  0x86   :  { %v1943_v37 = vpop.permute.xlu0 %127  ;;  %v1953_v45 = vpop.permute.xlu1 %117 }
  0x8a   :  { %v1947_v39 = vpop.permute.xlu0 %112 }
  0x8b   :  { %v1975_v5 = vpop.permute.xlu1 %255 }
  0x8e   :  { %v1951_v43 = vpop.permute.xlu0 %411 }
  0x90   :  { %v2017_v30 = vpop.permute.xlu1 %406 }
  0xad   :  { %v60_v46 = vpop.trf.xlu0 }
  0xae   :  { %v77_v47 = vrot.slane %v60_v46, 1  ;;  %v79_v48 = vrot.slane %v60_v46, 2  ;;  %v81_v49 = vrot.slane %v60_v46, 3  ;;  %v83_v50 = vrot.slane %v60_v46, 4 }
  0xaf   :  { %v85_v51 = vrot.slane %v60_v46, 5  ;;  %v87_v52 = vrot.slane %v60_v46, 6  ;;  %v89_v53 = vrot.slane %v60_v46, 7  ;;  %v1955_v54 = vrot.slane %v60_v46, %v132_v44 }
  0xb0   :  { %v1957_v55 = vrot.slane %v77_v47, %v132_v44  ;;  %v1959_v56 = vrot.slane %v79_v48, %v132_v44  ;;  %v1961_v57 = vrot.slane %v81_v49, %v132_v44  ;;  %v1963_v58 = vrot.slane %v83_v50, %v132_v44 }
  0xb1   :  { %v1965_v59 = vrot.slane %v85_v51, %v132_v44  ;;  %v1967_v60 = vrot.slane %v87_v52, %v132_v44  ;;  %v1969_v61 = vrot.slane %v89_v53, %v132_v44  ;;  %v61_v62 = vpop.trf.xlu0  ;;  %v1973_v63 = vmul.f32 %v1955_v54, %v1941_v36 }
  0xb2   :  { %v92_v0 = vrot.slane %v61_v62, 1  ;;  %v94_v1 = vrot.slane %v61_v62, 2  ;;  %v96_v2 = vrot.slane %v61_v62, 3  ;;  %v98_v3 = vrot.slane %v61_v62, 4 }
  0xb3   :  { %v100_v6 = vrot.slane %v61_v62, 5  ;;  %v102_v7 = vrot.slane %v61_v62, 6  ;;  %v104_v8 = vrot.slane %v61_v62, 7  ;;  %v1977_v9 = vrot.slane %v61_v62, %v132_v44 }
  0xb4   :  { %v1979_v10 = vrot.slane %v92_v0, %v132_v44  ;;  %v1981_v11 = vrot.slane %v94_v1, %v132_v44  ;;  %v1983_v12 = vrot.slane %v96_v2, %v132_v44  ;;  %v1985_v13 = vrot.slane %v98_v3, %v132_v44 }
  0xb5   :  { %v1987_v14 = vrot.slane %v100_v6, %v132_v44  ;;  %v1989_v15 = vrot.slane %v102_v7, %v132_v44  ;;  %v1991_v16 = vrot.slane %v104_v8, %v132_v44  ;;  %v222_v17 = vmul.f32 %v1959_v56, %v1941_v36 }
  0xb6   :  { %v223_v18 = vmul.f32 %v1961_v57, %v1941_v36  ;;  %v237_v19 = vmul.f32 %v1959_v56, %v1943_v37  ;;  %v238_v20 = vmul.f32 %v1961_v57, %v1943_v37  ;;  %v302_v21 = vmul.f32 %v1945_v38, %v1961_v57 }
  0xb7   :  { %v303_v22 = vmul.f32 %v1945_v38, %v1963_v58  ;;  %v317_v23 = vmul.f32 %v1949_v41, %v1961_v57  ;;  %v318_v24 = vmul.f32 %v1949_v41, %v1963_v58  ;;  %v224_v25 = vmul.f32 %v1963_v58, %v1941_v36 }
  0xb8   :  { %v362_v26 = vadd.f32 %v302_v21, %v222_v17  ;;  %v225_v27 = vmul.f32 %v1965_v59, %v1941_v36  ;;  %v226_v28 = vmul.f32 %v1967_v60, %v1941_v36  ;;  %v239_v29 = vmul.f32 %v1963_v58, %v1943_v37 }
  0xb9   :  { %v363_v31 = vadd.f32 %v303_v22, %v223_v18  ;;  %v377_v32 = vadd.f32 %v317_v23, %v237_v19  ;;  %v378_v33 = vadd.f32 %v318_v24, %v238_v20  ;;  %v240_v34 = vmul.f32 %v1965_v59, %v1943_v37 }
  0xba   :  { %v2022_v40 = vadd.f32 %v2017_v30, %v362_v26  ;;  %v241_v42 = vmul.f32 %v1967_v60, %v1943_v37  ;;  %v304_v44 = vmul.f32 %v1945_v38, %v1965_v59  ;;  %v305_v46 = vmul.f32 %v1945_v38, %v1967_v60 }
  0xbb   :  { %v447_v47 = vadd.f32 %v2017_v30, %v363_v31  ;;  %v2032_v48 = vadd.f32 %v1951_v43, %v377_v32  ;;  %v462_v49 = vadd.f32 %v1951_v43, %v378_v33  ;;  %v306_v50 = vmul.f32 %v1945_v38, %v1969_v61 }
  0xbc   :  { %v506_v51 = vmax.f32 %v2022_v40, 0.0  ;;  %v319_v52 = vmul.f32 %v1949_v41, %v1965_v59  ;;  %v320_v53 = vmul.f32 %v1949_v41, %v1967_v60  ;;  %v321_v62 = vmul.f32 %v1949_v41, %v1969_v61 }
  0xbd   :  { %v507_v0 = vmax.f32 %v447_v47, 0.0  ;;  %v521_v1 = vmax.f32 %v2032_v48, 0.0  ;;  %v522_v2 = vmax.f32 %v462_v49, 0.0  ;;  %v364_v3 = vadd.f32 %v304_v44, %v224_v25 }
  0xbe   :  { %v365_v6 = vadd.f32 %v305_v46, %v225_v27  ;;  %v366_v7 = vadd.f32 %v306_v50, %v226_v28  ;;  %v379_v8 = vadd.f32 %v319_v52, %v239_v29  ;;  %v380_v17 = vadd.f32 %v320_v53, %v240_v34  ;;  %v2074_v53 = vpop.permute.xlu1 %396 }
  0xbf   :  { %v564_v18 = vmax.f32 %v506_v51, %v507_v0  ;;  %v578_v19 = vmax.f32 %v521_v1, %v522_v2  ;;  %v381_v20 = vadd.f32 %v321_v62, %v241_v42  ;;  %v448_v21 = vadd.f32 %v2017_v30, %v364_v3 }
  0xc0   :  { %v449_v22 = vadd.f32 %v2017_v30, %v365_v6  ;;  %v2050_v23 = vadd.f32 %v2017_v30, %v366_v7  ;;  %v463_v24 = vadd.f32 %v1951_v43, %v379_v8  ;;  %v464_v25 = vadd.f32 %v1951_v43, %v380_v17 }
  0xc1   :  { %v2054_v26 = vpack.c.bf16 %v578_v19, %v564_v18  ;;  %v2057_v27 = vadd.f32 %v1951_v43, %v381_v20  ;;  %v508_v28 = vmax.f32 %v448_v21, 0.0  ;;  %v221_v29 = vmul.f32 %v1957_v55, %v1941_v36 }
  0xc2   :  { %v509_v31 = vmax.f32 %v449_v22, 0.0  ;;  %v3521_v32 = vmax.f32 %v2050_v23, 0.0  ;;  %v523_v33 = vmax.f32 %v463_v24, 0.0  ;;  %v524_v34 = vmax.f32 %v464_v25, 0.0 }
  0xc3   :  { %715 = vmatprep.subr.bf16.mxu0 %v2054_v26  ;;  %v3520_v42 = vmax.f32 %v2057_v27, 0.0  ;;  %v236_v44 = vmul.f32 %v1957_v55, %v1943_v37  ;;  %v301_v46 = vmul.f32 %v1945_v38, %v1959_v56  ;;  %v316_v47 = vmul.f32 %v1949_v41, %v1959_v56 }
  0xc4   :  { %v566_v48 = vmax.f32 %v508_v28, %v509_v31  ;;  %v2072_v49 = vmax.f32 %v509_v31, %v3521_v32  ;;  %v580_v50 = vmax.f32 %v523_v33, %v524_v34  ;;  %v565_v52 = vmax.f32 %v507_v0, %v508_v28 }
  0xc5   :  { %v2078_v62 = vmax.f32 %v524_v34, %v3520_v42  ;;  %v361_v3 = vadd.f32 %v301_v46, %v221_v29  ;;  %v376_v6 = vadd.f32 %v316_v47, %v236_v44  ;;  %v579_v7 = vmax.f32 %v522_v2, %v523_v33 }
  0xc6   :  { %v2080_v8 = vpack.c.bf16 %v580_v50, %v566_v48  ;;  %v192_v17 = vmul.f32 %v1959_v56, %v1947_v39  ;;  %v193_v18 = vmul.f32 %v1961_v57, %v1947_v39  ;;  %v207_v0 = vmul.f32 %v1959_v56, %v1953_v45 }
  0xc7   :  { %v2089_v19 = vadd.f32 %v2017_v30, %v361_v3  ;;  %v2092_v20 = vadd.f32 %v1951_v43, %v376_v6  ;;  %v2094_v21 = vpack.c.bf16 %v579_v7, %v565_v52  ;;  %v208_v2 = vmul.f32 %v1961_v57, %v1953_v45 }
  0xc8   :  { %788 = vmatprep.subr.bf16.mxu1 %v2080_v8  ;;  %v272_v22 = vmul.f32 %v1939_v35, %v1961_v57  ;;  %v273_v24 = vmul.f32 %v1939_v35, %v1963_v58  ;;  %v287_v25 = vmul.f32 %v1975_v5, %v1961_v57  ;;  %v288_v28 = vmul.f32 %v1975_v5, %v1963_v58  ;;  %v2114_v57 = vpop.permute.xlu1 %401 }
  0xc9   :  { %v505_v29 = vmax.f32 %v2089_v19, 0.0  ;;  %v520_v31 = vmax.f32 %v2092_v20, 0.0  ;;  %789 = vmatpush1.bf16.msra.mxu1 %v2094_v21  ;;  %v194_v33 = vmul.f32 %v1963_v58, %v1947_v39  ;;  %v195_v34 = vmul.f32 %v1965_v59, %v1947_v39 }
  0xca   :  { %v332_v44 = vadd.f32 %v272_v22, %v192_v17  ;;  %v333_v46 = vadd.f32 %v273_v24, %v193_v18  ;;  %v347_v47 = vadd.f32 %v287_v25, %v207_v0  ;;  %v348_v48 = vadd.f32 %v288_v28, %v208_v2 }
  0xcb   :  { %v563_v50 = vmax.f32 %v505_v29, %v506_v51  ;;  %v577_v52 = vmax.f32 %v520_v31, %v521_v1  ;;  %v209_v3 = vmul.f32 %v1963_v58, %v1953_v45  ;;  %v210_v6 = vmul.f32 %v1965_v59, %v1953_v45 }
  0xcc   :  { %v416_v7 = vadd.f32 %v2074_v53, %v332_v44  ;;  %v417_v17 = vadd.f32 %v2074_v53, %v333_v46  ;;  %v431_v18 = vadd.f32 %v2114_v57, %v347_v47  ;;  %v432_v40 = vadd.f32 %v2114_v57, %v348_v48 }
  0xcd   :  { %v2130_v0 = vpack.c.bf16 %v577_v52, %v563_v50  ;;  %v274_v51 = vmul.f32 %v1939_v35, %v1965_v59  ;;  %v275_v1 = vmul.f32 %v1939_v35, %v1967_v60  ;;  %v289_v58 = vmul.f32 %v1975_v5, %v1965_v59 }
  0xce   :  { %v476_v2 = vmax.f32 %v416_v7, 0.0  ;;  %v477_v22 = vmax.f32 %v417_v17, 0.0  ;;  %v491_v24 = vmax.f32 %v431_v18, 0.0  ;;  %v492_v25 = vmax.f32 %v432_v40, 0.0 }
  0xcf   :  { %716 = vmatpush1.bf16.msra.mxu0 %v2130_v0  ;;  %v290_v28 = vmul.f32 %v1975_v5, %v1967_v60  ;;  %v334_v44 = vadd.f32 %v274_v51, %v194_v33  ;;  %v335_v46 = vadd.f32 %v275_v1, %v195_v34  ;;  %v349_v47 = vadd.f32 %v289_v58, %v209_v3 }
  0xd0   :  { %v536_v48 = vmax.f32 %v476_v2, %v477_v22  ;;  %v550_v50 = vmax.f32 %v491_v24, %v492_v25  ;;  %v191_v52 = vmul.f32 %v1957_v55, %v1947_v39  ;;  %v206_v59 = vmul.f32 %v1957_v55, %v1953_v45 }
  0xd1   :  { %v350_v7 = vadd.f32 %v290_v28, %v210_v6  ;;  %v418_v17 = vadd.f32 %v2074_v53, %v334_v44  ;;  %v2147_v18 = vadd.f32 %v2074_v53, %v335_v46  ;;  %v433_v40 = vadd.f32 %v2114_v57, %v349_v47 }
  0xd2   :  { %v2150_v4 = vpack.c.bf16 %v550_v50, %v536_v48  ;;  %v271_v33 = vmul.f32 %v1939_v35, %v1959_v56  ;;  %v286_v34 = vmul.f32 %v1975_v5, %v1959_v56  ;;  %v235_v3 = vmul.f32 %v1955_v54, %v1943_v37 }
  0xd3   :  { %v2159_v6 = vadd.f32 %v2114_v57, %v350_v7  ;;  %v478_v51 = vmax.f32 %v418_v17, 0.0  ;;  %v3522_v1 = vmax.f32 %v2147_v18, 0.0  ;;  %v493_v58 = vmax.f32 %v433_v40, 0.0 }
  0xd4   :  { %717 = vmatprep.subr.bf16.mxu0 %v2150_v4  ;;  %v331_v28 = vadd.f32 %v271_v33, %v191_v52  ;;  %v346_v44 = vadd.f32 %v286_v34, %v206_v59  ;;  %v300_v46 = vmul.f32 %v1945_v38, %v1957_v55  ;;  %v315_v56 = vmul.f32 %v1949_v41, %v1957_v55 }
  0xd5   :  { %v494_v47 = vmax.f32 %v2159_v6, 0.0  ;;  %v538_v48 = vmax.f32 %v478_v51, %v3522_v1  ;;  %v537_v50 = vmax.f32 %v477_v22, %v478_v51  ;;  %v551_v7 = vmax.f32 %v492_v25, %v493_v58 }
  0xd6   :  { %v415_v17 = vadd.f32 %v2074_v53, %v331_v28  ;;  %v430_v40 = vadd.f32 %v2114_v57, %v346_v44  ;;  %v360_v52 = vadd.f32 %v300_v46, %v1973_v63  ;;  %v375_v59 = vadd.f32 %v315_v56, %v235_v3 }
  0xd7   :  { %v552_v33 = vmax.f32 %v493_v58, %v494_v47  ;;  %v593_v34 = vpack.c.bf16 %v551_v7, %v537_v50  ;;  %v190_v42 = vmul.f32 %v1955_v54, %v1947_v39  ;;  %v205_v32 = vmul.f32 %v1955_v54, %v1953_v45 }
  0xd8   :  { %v475_v1 = vmax.f32 %v415_v17, 0.0  ;;  %v490_v22 = vmax.f32 %v430_v40, 0.0  ;;  %v444_v25 = vadd.f32 %v2017_v30, %v360_v52  ;;  %v459_v51 = vadd.f32 %v1951_v43, %v375_v59 }
  0xd9   :  { %v2181_v28 = vpack.c.bf16 %v552_v33, %v538_v48  ;;  %v270_v63 = vmul.f32 %v1939_v35, %v1957_v55  ;;  %v285_v3 = vmul.f32 %v1975_v5, %v1957_v55  ;;  %v227_v58 = vmul.f32 %v1969_v61, %v1941_v36 }
  0xda   :  { %v535_v44 = vmax.f32 %v475_v1, %v476_v2  ;;  %v549_v46 = vmax.f32 %v490_v22, %v491_v24  ;;  %v504_v54 = vmax.f32 %v444_v25, 0.0  ;;  %v519_v56 = vmax.f32 %v459_v51, 0.0 }
  0xdb   :  { %790 = vmatprep.subr.bf16.mxu1 %v2181_v28  ;;  %v330_v50 = vadd.f32 %v270_v63, %v190_v42  ;;  %v345_v7 = vadd.f32 %v285_v3, %v205_v32  ;;  %v242_v48 = vmul.f32 %v1969_v61, %v1943_v37  ;;  %v307_v17 = vmul.f32 %v1945_v38, %v1977_v9 }
  0xdc   :  { %v591_v40 = vpack.c.bf16 %v549_v46, %v535_v44  ;;  %791 = vmatpush1.bf16.msra.mxu1 %v593_v34  ;;  %v562_v55 = vmax.f32 %v504_v54, %v505_v29  ;;  %v576_v2 = vmax.f32 %v519_v56, %v520_v31  ;;  %v322_v24 = vmul.f32 %v1949_v41, %v1977_v9 }
  0xdd   :  { %792 = vmatprep.subr.bf16.mxu1 %v2094_v21  ;;  %v414_v32 = vadd.f32 %v2074_v53, %v330_v50  ;;  %v429_v42 = vadd.f32 %v2114_v57, %v345_v7  ;;  %v367_v52 = vadd.f32 %v307_v17, %v227_v58  ;;  %v228_v59 = vmul.f32 %v1977_v9, %v1941_v36 }
  0xde   :  { %718 = vmatpush1.bf16.msra.mxu0 %v591_v40  ;;  %v604_v19 = vpack.c.bf16 %v576_v2, %v562_v55  ;;  %v382_v29 = vadd.f32 %v322_v24, %v242_v48  ;;  %v229_v20 = vmul.f32 %v1979_v10, %v1941_v36  ;;  %v243_v31 = vmul.f32 %v1977_v9, %v1943_v37 }
  0xdf   :  { %719 = vmatprep.subr.bf16.mxu0 %v2130_v0  ;;  %v474_v21 = vmax.f32 %v414_v32, 0.0  ;;  %v489_v33 = vmax.f32 %v429_v42, 0.0  ;;  %v451_v25 = vadd.f32 %v2017_v30, %v367_v52  ;;  %v244_v51 = vmul.f32 %v1979_v10, %v1943_v37 }
  0xe0   :  { %793 = vmatpush1.bf16.msra.mxu1 %v2054_v26  ;;  %v466_v63 = vadd.f32 %v1951_v43, %v382_v29  ;;  %v308_v3 = vmul.f32 %v1945_v38, %v1979_v10  ;;  %v309_v58 = vmul.f32 %v1945_v38, %v1981_v11  ;;  %v323_v0 = vmul.f32 %v1949_v41, %v1979_v10 }
  0xe1   :  { %794 = vmatprep.subr.bf16.mxu1 %v593_v34  ;;  %v534_v44 = vmax.f32 %v474_v21, %v475_v1  ;;  %v548_v46 = vmax.f32 %v489_v33, %v490_v22  ;;  %v511_v54 = vmax.f32 %v451_v25, 0.0  ;;  %v324_v56 = vmul.f32 %v1949_v41, %v1981_v11  ;;  %v2228_v1 = vld [vmem:[%s3513_s3] sm:$0xff]  }
  0xe2   :  { %720 = vmatpush1.bf16.msra.mxu0 %v604_v19  ;;  %v526_v26 = vmax.f32 %v466_v63, 0.0  ;;  %v368_v50 = vadd.f32 %v308_v3, %v228_v59  ;;  %v369_v7 = vadd.f32 %v309_v58, %v229_v20  ;;  %v383_v48 = vadd.f32 %v323_v0, %v243_v31 }
  0xe3   :  { %721 = vmatprep.subr.bf16.mxu0 %v591_v40  ;;  %v590_v17 = vpack.c.bf16 %v548_v46, %v534_v44  ;;  %v3566_v55 = vmax.f32 %v2050_v23, 0.0  ;;  %v384_v24 = vadd.f32 %v324_v56, %v244_v51  ;;  %v2232_v34 = vpack.c.bf16 %v2078_v62, %v2072_v49 }
  0xe4   :  { %795 = vmatpush1.bf16.msra.mxu1 %v2150_v4  ;;  %v3567_v22 = vmax.f32 %v2057_v27, 0.0  ;;  %v452_v40 = vadd.f32 %v2017_v30, %v368_v50  ;;  %v2239_v23 = vadd.f32 %v2017_v30, %v369_v7  ;;  %v467_v42 = vadd.f32 %v1951_v43, %v383_v48 }
  0xe5   :  { %v568_v2 = vmax.f32 %v3566_v55, %v511_v54  ;;  %v2243_v52 = vadd.f32 %v1951_v43, %v384_v24  ;;  %v196_v59 = vmul.f32 %v1967_v60, %v1947_v39  ;;  %v197_v49 = vmul.f32 %v1969_v61, %v1947_v39  ;;  %v2289_v55 = vld [vmem:[%s3513_s3 + $0x8] sm:$0xff]  }
  0xe6   :  { %v582_v32 = vmax.f32 %v3567_v22, %v526_v26  ;;  %v211_v4 = vmul.f32 %v1967_v60, %v1953_v45  ;;  %722 = vmatpush1.bf16.msra.mxu0 %v590_v17  ;;  %v512_v62 = vmax.f32 %v452_v40, 0.0  ;;  %v513_v19 = vmax.f32 %v2239_v23, 0.0 }
  0xe7   :  { %v527_v29 = vmax.f32 %v467_v42, 0.0  ;;  %v528_v20 = vmax.f32 %v2243_v52, 0.0  ;;  %1631 = vmatmul.mubr.msk.bf16.vlgmr.msra.gmra.mxu1 %vm694_vm0, %v2228_v1  ;;  %v212_v31 = vmul.f32 %v1969_v61, %v1953_v45  ;;  %v276_v21 = vmul.f32 %v1939_v35, %v1969_v61 }
  0xe8   :  { %v2251_v27 = vpack.c.bf16 %v582_v32, %v568_v2  ;;  %v277_v60 = vmul.f32 %v1939_v35, %v1977_v9  ;;  %v570_v33 = vmax.f32 %v512_v62, %v513_v19  ;;  %v569_v25 = vmax.f32 %v511_v54, %v512_v62 }
  0xe9   :  { %v583_v51 = vmax.f32 %v526_v26, %v527_v29  ;;  %v291_v63 = vmul.f32 %v1975_v5, %v1969_v61  ;;  %v584_v3 = vmax.f32 %v527_v29, %v528_v20  ;;  %1627 = vmatmul.mubr.msk.bf16.vlgmr.msra.gmra.mxu0 %vm694_vm0, %v2228_v1  ;;  %v292_v58 = vmul.f32 %v1975_v5, %v1977_v9 }
  0xea   :  { %861 = vmatprep.subr.bf16.mxu0 %v2251_v27  ;;  %v336_v0 = vadd.f32 %v276_v21, %v196_v59  ;;  %v337_v44 = vadd.f32 %v277_v60, %v197_v49  ;;  %v198_v56 = vmul.f32 %v1977_v9, %v1947_v39  ;;  %v199_v61 = vmul.f32 %v1979_v10, %v1947_v39 }
  0xeb   :  { %862 = vmatpush1.bf16.msra.mxu0 %v2232_v34  ;;  %v2275_v46 = vpack.c.bf16 %v583_v51, %v569_v25  ;;  %v351_v54 = vadd.f32 %v291_v63, %v211_v4  ;;  %v2281_v26 = vpack.c.bf16 %v584_v3, %v570_v33  ;;  %v352_v50 = vadd.f32 %v292_v58, %v212_v31 }
  0xec   :  { %v420_v7 = vadd.f32 %v2074_v53, %v336_v0  ;;  %v421_v48 = vadd.f32 %v2074_v53, %v337_v44  ;;  %v3568_v17 = vmov 0   ;;  %v213_v24 = vmul.f32 %v1977_v9, %v1953_v45 }
  0xed   :  { %749 = vmatprep.mubr.bf16.mxu0 %v3568_v17  ;;  %v435_v2 = vadd.f32 %v2114_v57, %v351_v54  ;;  %v214_v22 = vmul.f32 %v1979_v10, %v1953_v45  ;;  %v278_v32 = vmul.f32 %v1939_v35, %v1979_v10  ;;  %822 = vmatprep.mubr.bf16.mxu1 %v3568_v17  ;;  %v3569_v33 = vmax.f32 %v2147_v18, 0.0 }
  0xee   :  { %934 = vmatprep.subr.bf16.mxu1 %v2281_v26  ;;  %v436_v40 = vadd.f32 %v2114_v57, %v352_v50  ;;  %v480_v42 = vmax.f32 %v420_v7, 0.0  ;;  %v481_v59 = vmax.f32 %v421_v48, 0.0  ;;  %v279_v49 = vmul.f32 %v1939_v35, %v1981_v11 }
  0xef   :  { %935 = vmatpush1.bf16.msra.mxu1 %v2275_v46  ;;  %v495_v9 = vmax.f32 %v435_v2, 0.0  ;;  %v293_v4 = vmul.f32 %v1975_v5, %v1979_v10  ;;  %v294_v62 = vmul.f32 %v1975_v5, %v1981_v11  ;;  %v338_v29 = vadd.f32 %v278_v32, %v198_v56 }
  0xf0   :  { %v496_v31 = vmax.f32 %v436_v40, 0.0  ;;  %v540_v21 = vmax.f32 %v480_v42, %v481_v59  ;;  %v339_v60 = vadd.f32 %v279_v49, %v199_v61  ;;  %v539_v25 = vmax.f32 %v3569_v33, %v480_v42  ;;  %1632 = vmatmul.mubr.msk.bf16.gmra.mxu1 %vm694_vm0, %v2289_v55  ;;  %v2343_v40 = vld [vmem:[%s3513_s3 + $0x10] sm:$0xff]  }
  0xf1   :  { %v353_v51 = vadd.f32 %v293_v4, %v213_v24  ;;  %v354_v63 = vadd.f32 %v294_v62, %v214_v22  ;;  %v422_v3 = vadd.f32 %v2074_v53, %v338_v29  ;;  %v553_v10 = vmax.f32 %v494_v47, %v495_v9  ;;  %832 = vmatprep.mubr.bf16.mxu1 %v3568_v17 }
  0xf2   :  { %v554_v58 = vmax.f32 %v495_v9, %v496_v31  ;;  %v2317_v0 = vadd.f32 %v2074_v53, %v339_v60  ;;  %1628 = vmatmul.mubr.msk.bf16.gmra.mxu0 %vm694_vm0, %v2289_v55  ;;  %v230_v18 = vmul.f32 %v1981_v11, %v1941_v36  ;;  %v231_v44 = vmul.f32 %v1983_v12, %v1941_v36 }
  0xf3   :  { %v437_v54 = vadd.f32 %v2114_v57, %v353_v51  ;;  %v2327_v6 = vadd.f32 %v2114_v57, %v354_v63  ;;  %v482_v47 = vmax.f32 %v422_v3, 0.0  ;;  %v595_v56 = vpack.c.bf16 %v553_v10, %v539_v25  ;;  %759 = vmatprep.mubr.bf16.mxu0 %v3568_v17 }
  0xf4   :  { %v2330_v61 = vpack.c.bf16 %v554_v58, %v540_v21  ;;  %v483_v50 = vmax.f32 %v2317_v0, 0.0  ;;  %v245_v7 = vmul.f32 %v1981_v11, %v1943_v37  ;;  %v246_v48 = vmul.f32 %v1983_v12, %v1943_v37 }
  0xf5   :  { %v497_v2 = vmax.f32 %v437_v54, 0.0  ;;  %v498_v24 = vmax.f32 %v2327_v6, 0.0  ;;  %v541_v22 = vmax.f32 %v481_v59, %v482_v47  ;;  %v310_v32 = vmul.f32 %v1945_v38, %v1983_v12 }
  0xf6   :  { %863 = vmatprep.subr.bf16.mxu0 %v2330_v61  ;;  %v542_v42 = vmax.f32 %v482_v47, %v483_v50  ;;  %v311_v49 = vmul.f32 %v1945_v38, %v1985_v13  ;;  %v325_v9 = vmul.f32 %v1949_v41, %v1983_v12  ;;  %v326_v59 = vmul.f32 %v1949_v41, %v1985_v13 }
  0xf7   :  { %v556_v4 = vmax.f32 %v497_v2, %v498_v24  ;;  %864 = vmatpush1.bf16.msra.mxu0 %v595_v56  ;;  %v555_v62 = vmax.f32 %v496_v31, %v497_v2  ;;  %v370_v29 = vadd.f32 %v310_v32, %v230_v18  ;;  %v232_v21 = vmul.f32 %v1985_v13, %v1941_v36 }
  0xf8   :  { %865 = vmatprep.subr.bf16.mxu0 %v2232_v34  ;;  %v371_v60 = vadd.f32 %v311_v49, %v231_v44  ;;  %v385_v33 = vadd.f32 %v325_v9, %v245_v7  ;;  %v386_v25 = vadd.f32 %v326_v59, %v246_v48  ;;  %v233_v51 = vmul.f32 %v1987_v14, %v1941_v36  ;;  %v2390_v59 = vld [vmem:[%s3513_s3 + $0x18] sm:$0xff]  }
  0xf9   :  { %v2361_v63 = vpack.c.bf16 %v556_v4, %v542_v42  ;;  %v597_v3 = vpack.c.bf16 %v555_v62, %v541_v22  ;;  %v454_v10 = vadd.f32 %v2017_v30, %v370_v29  ;;  %v247_v31 = vmul.f32 %v1985_v13, %v1943_v37  ;;  %1633 = vmatmul.mubr.msk.bf16.gmra.mxu1 %vm694_vm0, %v2343_v40 }
  0xfa   :  { %v455_v58 = vadd.f32 %v2017_v30, %v371_v60  ;;  %v469_v34 = vadd.f32 %v1951_v43, %v385_v33  ;;  %v470_v18 = vadd.f32 %v1951_v43, %v386_v25  ;;  %v248_v44 = vmul.f32 %v1987_v14, %v1943_v37  ;;  %1629 = vmatmul.mubr.msk.bf16.gmra.mxu0 %vm694_vm0, %v2343_v40 }
  0xfb   :  { %936 = vmatprep.subr.bf16.mxu1 %v2361_v63  ;;  %866 = vmatpush1.bf16.msra.mxu0 %v2080_v8  ;;  %v514_v54 = vmax.f32 %v454_v10, 0.0  ;;  %v312_v47 = vmul.f32 %v1945_v38, %v1987_v14  ;;  %v313_v7 = vmul.f32 %v1945_v38, %v1989_v15  ;;  %v327_v48 = vmul.f32 %v1949_v41, %v1987_v14 }
  0xfc   :  { %937 = vmatpush1.bf16.msra.mxu1 %v597_v3  ;;  %867 = vmatprep.subr.bf16.mxu0 %v595_v56  ;;  %v515_v2 = vmax.f32 %v455_v58, 0.0  ;;  %v529_v22 = vmax.f32 %v469_v34, 0.0  ;;  %v530_v32 = vmax.f32 %v470_v18, 0.0  ;;  %v328_v42 = vmul.f32 %v1949_v41, %v1989_v15 }
  0xfd   :  { %938 = vmatprep.subr.bf16.mxu1 %v2275_v46  ;;  %v372_v8 = vadd.f32 %v312_v47, %v232_v21  ;;  %v373_v49 = vadd.f32 %v313_v7, %v233_v51  ;;  %v387_v9 = vadd.f32 %v327_v48, %v247_v31  ;;  %769 = vmatprep.mubr.bf16.mxu0 %v3568_v17 }
  0xfe   :  { %v572_v4 = vmax.f32 %v514_v54, %v515_v2  ;;  %v586_v56 = vmax.f32 %v529_v22, %v530_v32  ;;  %v388_v62 = vadd.f32 %v328_v42, %v248_v44  ;;  %842 = vmatprep.mubr.bf16.mxu1 %v3568_v17  ;;  %v571_v29 = vmax.f32 %v513_v19, %v514_v54 }
  0xff   :  { %868 = vmatpush1.bf16.msra.mxu0 %v2181_v28  ;;  %v456_v46 = vadd.f32 %v2017_v30, %v372_v8  ;;  %v2398_v21 = vadd.f32 %v2017_v30, %v373_v49  ;;  %v471_v60 = vadd.f32 %v1951_v43, %v387_v9  ;;  %v585_v33 = vmax.f32 %v528_v20, %v529_v22 }
 0x100   :  { %939 = vmatpush1.bf16.msra.mxu1 %v2251_v27  ;;  %v2404_v25 = vpack.c.bf16 %v586_v56, %v572_v4  ;;  %v2407_v51 = vadd.f32 %v1951_v43, %v388_v62  ;;  %v200_v28 = vmul.f32 %v1981_v11, %v1947_v39  ;;  %v201_v23 = vmul.f32 %v1983_v12, %v1947_v39 }
 0x101   :  { %940 = vmatprep.subr.bf16.mxu1 %v597_v3  ;;  %v516_v19 = vmax.f32 %v456_v46, 0.0  ;;  %v517_v10 = vmax.f32 %v2398_v21, 0.0  ;;  %v531_v31 = vmax.f32 %v471_v60, 0.0  ;;  %1634 = vmatmul.mubr.msk.bf16.gmra.mxu1 %vm694_vm0, %v2390_v59  ;;  %v2416_v52 = vpack.c.bf16 %v585_v33, %v571_v29 }
 0x102   :  { %1007 = vmatprep.subr.bf16.mxu0 %v2404_v25  ;;  %v532_v27 = vmax.f32 %v2407_v51, 0.0  ;;  %1630 = vmatmul.mubr.msk.bf16.gmra.mxu0 %vm694_vm0, %v2390_v59  ;;  %v215_v20 = vmul.f32 %v1981_v11, %v1953_v45  ;;  %v216_v3 = vmul.f32 %v1983_v12, %v1953_v45  ;;  %v280_v58 = vmul.f32 %v1939_v35, %v1983_v12 }
 0x103   :  { %v574_v34 = vmax.f32 %v516_v19, %v517_v10  ;;  %885 = vmatprep.mubr.bf16.mxu0 %v3568_v17  ;;  %958 = vmatprep.mubr.bf16.mxu1 %v3568_v17  ;;  %v573_v18 = vmax.f32 %v515_v2, %v516_v19  ;;  %v587_v44 = vmax.f32 %v530_v32, %v531_v31 }
 0x104   :  { %941 = vmatpush1.bf16.msra.mxu1 %v2330_v61  ;;  %v588_v11 = vmax.f32 %v531_v31, %v532_v27  ;;  %v281_v54 = vmul.f32 %v1939_v35, %v1985_v13  ;;  %v295_v47 = vmul.f32 %v1975_v5, %v1983_v12  ;;  %v296_v7 = vmul.f32 %v1975_v5, %v1985_v13 }
 0x105   :  { %v2441_v48 = vpack.c.bf16 %v587_v44, %v573_v18  ;;  %v340_v22 = vadd.f32 %v280_v58, %v200_v28  ;;  %v202_v2 = vmul.f32 %v1985_v13, %v1947_v39  ;;  %v203_v61 = vmul.f32 %v1987_v14, %v1947_v39 }
 0x106   :  { %v2447_v32 = vpack.c.bf16 %v588_v11, %v574_v34  ;;  %v341_v42 = vadd.f32 %v281_v54, %v201_v23  ;;  %v355_v8 = vadd.f32 %v295_v47, %v215_v20  ;;  %v356_v49 = vadd.f32 %v296_v7, %v216_v3 }
 0x107   :  { %v424_v9 = vadd.f32 %v2074_v53, %v340_v22  ;;  %v217_v12 = vmul.f32 %v1985_v13, %v1953_v45  ;;  %v218_v4 = vmul.f32 %v1987_v14, %v1953_v45  ;;  %v282_v56 = vmul.f32 %v1939_v35, %v1987_v14 }
 0x108   :  { %1080 = vmatprep.subr.bf16.mxu1 %v2447_v32  ;;  %v425_v62 = vadd.f32 %v2074_v53, %v341_v42  ;;  %v439_v29 = vadd.f32 %v2114_v57, %v355_v8  ;;  %v440_v46 = vadd.f32 %v2114_v57, %v356_v49  ;;  %v283_v60 = vmul.f32 %v1939_v35, %v1989_v15 }
 0x109   :  { %1639 = vmatmul.mubr.msk.bf16.vlgmr.msra.gmra.mxu1 %vm694_vm0, %v2228_v1  ;;  %v484_v13 = vmax.f32 %v424_v9, 0.0  ;;  %v297_v33 = vmul.f32 %v1975_v5, %v1987_v14  ;;  %v298_v28 = vmul.f32 %v1975_v5, %v1989_v15  ;;  %v342_v23 = vadd.f32 %v282_v56, %v202_v2 }
 0x10a   :  { %1635 = vmatmul.mubr.msk.bf16.vlgmr.msra.gmra.mxu0 %vm694_vm0, %v2228_v1  ;;  %1081 = vmatpush1.bf16.msra.mxu1 %v2441_v48  ;;  %v485_v19 = vmax.f32 %v425_v62, 0.0  ;;  %v499_v31 = vmax.f32 %v439_v29, 0.0  ;;  %v500_v20 = vmax.f32 %v440_v46, 0.0  ;;  %v343_v3 = vadd.f32 %v283_v60, %v203_v61 }
 0x10b   :  { %1008 = vmatpush1.bf16.msra.mxu0 %v2416_v52  ;;  %v357_v58 = vadd.f32 %v297_v33, %v217_v12  ;;  %v358_v34 = vadd.f32 %v298_v28, %v218_v4  ;;  %v426_v18 = vadd.f32 %v2074_v53, %v342_v23  ;;  %v543_v14 = vmax.f32 %v483_v50, %v484_v13 }
 0x10c   :  { %v544_v44 = vmax.f32 %v484_v13, %v485_v19  ;;  %v558_v11 = vmax.f32 %v499_v31, %v500_v20  ;;  %v2476_v54 = vadd.f32 %v2074_v53, %v343_v3  ;;  %v557_v47 = vmax.f32 %v498_v24, %v499_v31  ;;  %895 = vmatprep.mubr.bf16.mxu0 %v3568_v17 }
 0x10d   :  { %v441_v7 = vadd.f32 %v2114_v57, %v357_v58  ;;  %v2483_v22 = vadd.f32 %v2114_v57, %v358_v34  ;;  %v486_v2 = vmax.f32 %v426_v18, 0.0  ;;  %968 = vmatprep.mubr.bf16.mxu1 %v3568_v17  ;;  %v234_v0 = vmul.f32 %v1989_v15, %v1941_v36  ;;  %v2597_v34 = vld [vmem:[%s3515_s5 + $0x8] sm:$0xff] }
 0x10e   :  { %v600_v50 = vpack.c.bf16 %v558_v11, %v544_v44  ;;  %v487_v61 = vmax.f32 %v2476_v54, 0.0  ;;  %v249_v6 = vmul.f32 %v1989_v15, %v1943_v37  ;;  %v599_v8 = vpack.c.bf16 %v557_v47, %v543_v14  ;;  %3571 = vst [vmem:[#allocation6_spill] sm:$0xff] %v2597_v34 }
 0x10f   :  { %v501_v24 = vmax.f32 %v441_v7, 0.0  ;;  %v502_v42 = vmax.f32 %v2483_v22, 0.0  ;;  %v314_v49 = vmul.f32 %v1991_v16, %v1945_v38  ;;  %v545_v12 = vmax.f32 %v485_v19, %v486_v2 }
 0x110   :  { %1009 = vmatprep.subr.bf16.mxu0 %v600_v50  ;;  %v546_v9 = vmax.f32 %v486_v2, %v487_v61  ;;  %v329_v4 = vmul.f32 %v1991_v16, %v1949_v41  ;;  %v284_v33 = vmul.f32 %v1991_v16, %v1939_v35  ;;  %v299_v28 = vmul.f32 %v1991_v16, %v1975_v5 }
 0x111   :  { %v560_v36 = vmax.f32 %v501_v24, %v502_v42  ;;  %1010 = vmatpush1.bf16.msra.mxu0 %v599_v8  ;;  %v559_v56 = vmax.f32 %v500_v20, %v501_v24  ;;  %1640 = vmatmul.mubr.msk.bf16.gmra.mxu1 %vm694_vm0, %v2289_v55  ;;  %v374_v37 = vadd.f32 %v314_v49, %v234_v0 }
 0x112   :  { %1011 = vmatprep.subr.bf16.mxu0 %v2416_v52  ;;  %1636 = vmatmul.mubr.msk.bf16.gmra.mxu0 %vm694_vm0, %v2289_v55  ;;  %v389_v62 = vadd.f32 %v329_v4, %v249_v6  ;;  %v204_v52 = vmul.f32 %v1989_v15, %v1947_v39  ;;  %v1658_v11 = vcombine.high %v2597_v34, %v2597_v34 }
 0x113   :  { %v602_v38 = vpack.c.bf16 %v560_v36, %v546_v9  ;;  %v458_v29 = vadd.f32 %v2017_v30, %v374_v37  ;;  %905 = vmatprep.mubr.bf16.mxu0 %v3568_v17  ;;  %978 = vmatprep.mubr.bf16.mxu1 %v3568_v17  ;;  %v601_v41 = vpack.c.bf16 %v559_v56, %v545_v12 }
 0x114   :  { %v473_v46 = vadd.f32 %v1951_v43, %v389_v62  ;;  %v219_v30 = vmul.f32 %v1989_v15, %v1953_v45  ;;  %v344_v35 = vadd.f32 %v284_v33, %v204_v52 }
 0x115   :  { %1082 = vmatprep.subr.bf16.mxu1 %v602_v38  ;;  %1012 = vmatpush1.bf16.msra.mxu0 %v2281_v26  ;;  %v518_v60 = vmax.f32 %v458_v29, 0.0 }
 0x116   :  { %1083 = vmatpush1.bf16.msra.mxu1 %v601_v41  ;;  %1013 = vmatprep.subr.bf16.mxu0 %v599_v8  ;;  %v533_v13 = vmax.f32 %v473_v46, 0.0  ;;  %v359_v5 = vadd.f32 %v299_v28, %v219_v30  ;;  %v428_v15 = vadd.f32 %v2074_v53, %v344_v35 }
 0x117   :  { %1084 = vmatprep.subr.bf16.mxu1 %v2441_v48  ;;  %v575_v43 = vmax.f32 %v517_v10, %v518_v60  ;;  %v2576_v10 = vld [vmem:[%s3515_s5] sm:$0xff] }
 0x118   :  { %v589_v39 = vmax.f32 %v532_v27, %v533_v13  ;;  %v443_v16 = vadd.f32 %v2114_v57, %v359_v5  ;;  %v488_v26 = vmax.f32 %v428_v15, 0.0  ;;  %v2567_v57 = vpop.permute.xlu1 %666 }
 0x119   :  { %1014 = vmatpush1.bf16.msra.mxu0 %v2361_v63  ;;  %1641 = vmatmul.mubr.msk.bf16.gmra.mxu1 %vm694_vm0, %v2343_v40 }
 0x11a   :  { %1085 = vmatpush1.bf16.msra.mxu1 %v2404_v25  ;;  %v617_v45 = vpack.c.bf16 %v589_v39, %v575_v43  ;;  %1637 = vmatmul.mubr.msk.bf16.gmra.mxu0 %vm694_vm0, %v2343_v40  ;;  %v503_v63 = vmax.f32 %v443_v16, 0.0  ;;  %v547_v21 = vmax.f32 %v487_v61, %v488_v26 }
 0x11b   :  { %1086 = vmatprep.subr.bf16.mxu1 %v601_v41  ;;  %915 = vmatprep.mubr.bf16.mxu0 %v3568_v17 }
 0x11c   :  { %1735 = vmatprep.subr.bf16.mxu0 %v617_v45  ;;  %988 = vmatprep.mubr.bf16.mxu1 %v3568_v17  ;;  %v561_v25 = vmax.f32 %v502_v42, %v503_v63 }
 0x11e   :  { %1087 = vmatpush1.bf16.msra.mxu1 %v600_v50  ;;  %v603_v53 = vpack.c.bf16 %v561_v25, %v547_v21 }
 0x121   :  { %1642 = vmatmul.mubr.msk.bf16.gmra.mxu1 %vm694_vm0, %v2390_v59 }
 0x122   :  { %1638 = vmatmul.mubr.msk.bf16.gmra.mxu0 %vm694_vm0, %v2390_v59  ;;  %1104 = vmatprep.mubr.bf16.mxu1 %v3568_v17 }
 0x123   :  { %1031 = vmatprep.mubr.bf16.mxu0 %v3568_v17 }
 0x129   :  { %1647 = vmatmul.mubr.msk.bf16.vlgmr.msra.gmra.mxu1 %vm694_vm0, %v2228_v1 }
 0x12a   :  { %1643 = vmatmul.mubr.msk.bf16.vlgmr.msra.gmra.mxu0 %vm694_vm0, %v2228_v1  ;;  %1114 = vmatprep.mubr.bf16.mxu1 %v3568_v17 }
 0x12b   :  { %1736 = vmatpush3.bf16.msra.mxu0 %v617_v45  ;;  %1041 = vmatprep.mubr.bf16.mxu0 %v3568_v17 }
 0x12c   :  { %1737 = vmatprep.subr.bf16.mxu0 %v603_v53 }
 0x12f   :  { %1738 = vmatpush3.bf16.msra.mxu0 %v603_v53 }
 0x130   :  { %1739 = vmatprep.subr.bf16.mxu0 %v2447_v32 }
 0x131   :  { %1648 = vmatmul.mubr.msk.bf16.gmra.mxu1 %vm694_vm0, %v2289_v55 }
 0x132   :  { %1644 = vmatmul.mubr.msk.bf16.gmra.mxu0 %vm694_vm0, %v2289_v55  ;;  %1124 = vmatprep.mubr.bf16.mxu1 %v3568_v17 }
 0x133   :  { %1740 = vmatpush3.bf16.msra.mxu0 %v2447_v32  ;;  %1051 = vmatprep.mubr.bf16.mxu0 %v3568_v17 }
 0x134   :  { %1741 = vmatprep.subr.bf16.mxu0 %v602_v38 }
 0x137   :  { %1742 = vmatpush3.bf16.msra.mxu0 %v602_v38 }
 0x139   :  { %1649 = vmatmul.mubr.msk.bf16.gmra.mxu1 %vm694_vm0, %v2343_v40 }
 0x13a   :  { %1645 = vmatmul.mubr.msk.bf16.gmra.mxu0 %vm694_vm0, %v2343_v40  ;;  %1134 = vmatprep.mubr.bf16.mxu1 %v3568_v17 }
 0x13b   :  { %1061 = vmatprep.mubr.bf16.mxu0 %v3568_v17  ;;  %v2569_v17 = vpop.permute.xlu1 %671 }
 0x13f   :  { %v2571_v51 = vpop.permute.xlu1 %656 }
 0x140   :  { %3570 = vst [vmem:[#allocation5_spill] sm:$0xff] %v2571_v51 }
 0x141   :  { %1650 = vmatmul.mubr.msk.bf16.gmra.mxu1 %vm694_vm0, %v2390_v59 }
 0x142   :  { %1646 = vmatmul.mubr.msk.bf16.gmra.mxu0 %vm694_vm0, %v2390_v59 }
 0x143   :  { %1743 = vmatprep.mubr.msk.bf16.mxu0 %vm694_vm0, %v2228_v1  ;;  %v2578_v1 = vpop.permute.xlu1 %661 }
 0x14a   :  { %1744 = vmatmul.mubr.msk.bf16.vlgmr.msra.gmra.mxu0 %vm694_vm0, %v2289_v55  ;;  %v1656_v55 = vcombine.high %v2576_v10, %v2576_v10 }
 0x14b   :  { %1747 = vmatprep.mubr.msk.bf16.mxu0 %vm694_vm0, %v2343_v40  ;;  %v2582_v40 = vpop.permute.xlu1 %646 }
 0x14c   :  { %1520 = vmatprep.mubr.bf16.mxu1 %v1656_v55 }
 0x152   :  { %1748 = vmatmul.mubr.msk.bf16.gmra.mxu0 %vm694_vm0, %v2390_v59  ;;  %v2584_v59 = vpop.permute.xlu1 %651 }
 0x153   :  { %1560 = vmatprep.mubr.bf16.mxu0 %v1658_v11 }
 0x156   :  { %v2586_v27 = vpop.permute.xlu1 %636 }
 0x15a   :  { %v2591_v3 = vpop.permute.xlu1 %641 }
 0x1a7   :  { %v814_v48 = vpop.f32.mrf.mxu1 }
 0x1a8   :  { %v2600_v18 = vadd.f32 %v814_v48, %v2586_v27 }
 0x1a9   :  { %v741_v32 = vpop.f32.mrf.mxu0  ;;  %v2588_v23 = vpop.f32.mrf.mxu1 }
 0x1aa   :  { %v742_v19 = vadd.f32 %v741_v32, %v2586_v27  ;;  %v3526_v42 = vmax.f32 %v2600_v18, 0.0 }
 0x1ab   :  { %v743_v31 = vpop.f32.mrf.mxu0  ;;  %v818_v20 = vpop.f32.mrf.mxu1 }
 0x1ac   :  { %v744_v58 = vadd.f32 %v743_v31, %v2586_v27  ;;  %v1210_v54 = vmax.f32 %v742_v19, 0.0  ;;  %v2608_v22 = vadd.f32 %v818_v20, %v2591_v3 }
 0x1ad   :  { %v745_v14 = vpop.f32.mrf.mxu0  ;;  %v2602_v44 = vpop.f32.mrf.mxu1 }
 0x1ae   :  { %v1211_v47 = vmax.f32 %v744_v58, 0.0  ;;  %v746_v7 = vadd.f32 %v745_v14, %v2591_v3  ;;  %v3525_v49 = vmax.f32 %v2608_v22, 0.0 }
 0x1af   :  { %v747_v2 = vpop.f32.mrf.mxu0 }
 0x1b0   :  { %v2610_v0 = vpop.f32.mrf.mxu1  ;;  %v2612_v50 = vmax.f32 %v1210_v54, %v1211_v47  ;;  %v748_v61 = vadd.f32 %v747_v2, %v2591_v3  ;;  %v1223_v8 = vmax.f32 %v746_v7, 0.0  ;;  %v2623_v36 = vmax.f32 %v1211_v47, %v3526_v42 }
 0x1b2   :  { %3572 = vst [vmem:[#allocation7_spill] sm:$0xff] %v2612_v50  ;;  %v751_v6 = vpop.f32.mrf.mxu0  ;;  %v2615_v24 = vpop.f32.mrf.mxu1  ;;  %v1224_v9 = vmax.f32 %v748_v61, 0.0  ;;  %3573 = vst [vmem:[#allocation8_spill] sm:$0xff] %v2623_v36 }
 0x1b3   :  { %v752_v60 = vadd.f32 %v751_v6, %v2582_v40 }
 0x1b4   :  { %v753_v12 = vpop.f32.mrf.mxu0  ;;  %v2619_v4 = vpop.f32.mrf.mxu1  ;;  %v2625_v56 = vmax.f32 %v1223_v8, %v1224_v9  ;;  %v2629_v37 = vmax.f32 %v1224_v9, %v3525_v49 }
 0x1b5   :  { %v2632_v62 = vadd.f32 %v753_v12, %v2582_v40  ;;  %v1236_v39 = vmax.f32 %v752_v60, 0.0 }
 0x1b6   :  { %3574 = vst [vmem:[#allocation9_spill] sm:$0xff] %v2625_v56  ;;  %3575 = vst [vmem:[#allocation10_spill] sm:$0xff] %v2629_v37  ;;  %v755_v38 = vpop.f32.mrf.mxu0  ;;  %v2634_v29 = vpop.f32.mrf.mxu1 }
 0x1b7   :  { %v756_v52 = vadd.f32 %v755_v38, %v2584_v59  ;;  %v3523_v30 = vmax.f32 %v2632_v62, 0.0 }
 0x1b8   :  { %v757_v13 = vpop.f32.mrf.mxu0 }
 0x1b9   :  { %v2644_v33 = vadd.f32 %v757_v13, %v2584_v59  ;;  %v2646_v28 = vpop.f32.mrf.mxu1  ;;  %v1249_v45 = vmax.f32 %v756_v52, 0.0  ;;  %v2657_v16 = vmax.f32 %v1236_v39, %v3523_v30 }
 0x1ba   :  { %v2648_v43 = vpop.f32.mrf.mxu0 }
 0x1bb   :  { %v3524_v35 = vmax.f32 %v2644_v33, 0.0  ;;  %v2651_v5 = vpop.f32.mrf.mxu1  ;;  %3576 = vst [vmem:[#allocation11_spill] sm:$0xff] %v2657_v16 }
 0x1bc   :  { %v2653_v15 = vpop.f32.mrf.mxu0 }
 0x1bd   :  { %v2661_v26 = vmax.f32 %v1249_v45, %v3524_v35  ;;  %v2663_v63 = vpop.f32.mrf.mxu1 }
 0x1be   :  { %v2665_v21 = vpop.f32.mrf.mxu0 }
 0x1bf   :  { %3577 = vst [vmem:[#allocation12_spill] sm:$0xff] %v2661_v26  ;;  %v2669_v53 = vpop.f32.mrf.mxu1  ;;  %v3593_v26 = vmax.f32 %v2600_v18, 0.0 }
 0x1c0   :  { %v2671_v55 = vpop.f32.mrf.mxu0 }
 0x1c1   :  { %v2673_v48 = vpop.f32.mrf.mxu1 }
 0x1c2   :  { %v2675_v32 = vpop.f32.mrf.mxu0 }
 0x1c3   :  { %v2677_v19 = vpop.f32.mrf.mxu1 }
 0x1c4   :  { %v2679_v31 = vpop.f32.mrf.mxu0 }
 0x1c5   :  { %v2681_v20 = vpop.f32.mrf.mxu1 }
 0x1c6   :  { %v2683_v58 = vpop.f32.mrf.mxu0 }
 0x1c7   :  { %v2685_v14 = vpop.f32.mrf.mxu1 }
 0x1c8   :  { %v777_v11 = vpop.f32.mrf.mxu0 }
 0x1c9   :  { %v960_v54 = vpop.f32.mrf.mxu1 }
 0x1ca   :  { %v887_v47 = vpop.f32.mrf.mxu0  ;;  %v2691_v8 = vadd.f32 %v960_v54, %v2586_v27 }
 0x1cb   :  { %v2687_v7 = vpop.f32.mrf.mxu1  ;;  %v2694_v12 = vadd.f32 %v887_v47, %v2586_v27 }
 0x1cc   :  { %v889_v2 = vpop.f32.mrf.mxu0  ;;  %3578 = vst [vmem:[#allocation13_spill] sm:$0xff] %v2691_v8  ;;  %v3530_v54 = vmax.f32 %v2691_v8, 0.0 }
 0x1cd   :  { %v890_v61 = vadd.f32 %v889_v2, %v2586_v27  ;;  %v964_v6 = vpop.f32.mrf.mxu1  ;;  %v3528_v47 = vmax.f32 %v2694_v12, 0.0 }
 0x1ce   :  { %v891_v9 = vpop.f32.mrf.mxu0  ;;  %v2697_v38 = vadd.f32 %v964_v6, %v2591_v3 }
 0x1cf   :  { %v2699_v60 = vpop.f32.mrf.mxu1  ;;  %v2702_v52 = vadd.f32 %v891_v9, %v2591_v3  ;;  %v1215_v39 = vmax.f32 %v890_v61, 0.0 }
 0x1d0   :  { %3579 = vst [vmem:[#allocation14_spill] sm:$0xff] %v2697_v38  ;;  %v893_v13 = vpop.f32.mrf.mxu0  ;;  %v3532_v25 = vmax.f32 %v2697_v38, 0.0 }
 0x1d1   :  { %v894_v45 = vadd.f32 %v893_v13, %v2591_v3  ;;  %v2705_v2 = vpop.f32.mrf.mxu1  ;;  %v3531_v6 = vmax.f32 %v2702_v52, 0.0  ;;  %v2719_v61 = vmax.f32 %v3528_v47, %v1215_v39  ;;  %v2723_v13 = vmax.f32 %v1215_v39, %v3530_v54 }
 0x1d2   :  { %v2708_v41 = vpop.f32.mrf.mxu0 }
 0x1d3   :  { %v1228_v46 = vmax.f32 %v894_v45, 0.0  ;;  %v2713_v30 = vpop.f32.mrf.mxu1  ;;  %3580 = vst [vmem:[#allocation15_spill] sm:$0xff] %v2719_v61  ;;  %3581 = vst [vmem:[#allocation16_spill] sm:$0xff] %v2723_v13  ;;  %v2777_v61 = vadd.f32 %v2634_v29, %v2584_v59 }
 0x1d4   :  { %v2715_v9 = vpop.f32.mrf.mxu0 }
 0x1d5   :  { %v2727_v35 = vmax.f32 %v3531_v6, %v1228_v46  ;;  %v2731_v49 = vmax.f32 %v1228_v46, %v3532_v25  ;;  %v2733_v45 = vpop.f32.mrf.mxu1  ;;  %v2747_v6 = vadd.f32 %v2588_v23, %v2586_v27  ;;  %v2751_v46 = vadd.f32 %v2602_v44, %v2591_v3 }
 0x1d6   :  { %v901_v42 = vpop.f32.mrf.mxu0  ;;  %v2763_v23 = vadd.f32 %v2610_v0, %v2582_v40  ;;  %v2767_v44 = vadd.f32 %v2615_v24, %v2582_v40  ;;  %v1252_v18 = vmax.f32 %v2777_v61, 0.0  ;;  %v2830_v61 = vadd.f32 %v2681_v20, %v2569_v17 }
 0x1d7   :  { %3582 = vst [vmem:[#allocation17_spill] sm:$0xff] %v2727_v35  ;;  %3583 = vst [vmem:[#allocation18_spill] sm:$0xff] %v2731_v49  ;;  %v2739_v8 = vpop.f32.mrf.mxu1  ;;  %v2771_v49 = vadd.f32 %v2619_v4, %v2584_v59  ;;  %v3592_v0 = vmax.f32 %v2747_v6, 0.0  ;;  %v3594_v38 = vmax.f32 %v2751_v46, 0.0  ;;  %v3595_v4 = vmax.f32 %v2608_v22, 0.0 }
 0x1d8   :  { %3584 = vst [vmem:[#allocation19_spill] sm:$0xff] %v2739_v8  ;;  %v2741_v39 = vpop.f32.mrf.mxu0  ;;  %v839_v20 = vadd.f32 %v2663_v63, %v2578_v1 }
 0x1d9   :  { %v2743_v54 = vpop.f32.mrf.mxu1  ;;  %v2787_v24 = vmax.f32 %v3593_v26, %v3592_v0  ;;  %v2793_v36 = vmax.f32 %v3595_v4, %v3594_v38  ;;  %v2806_v26 = vadd.f32 %v2646_v28, %v2571_v51  ;;  %v2822_v4 = vadd.f32 %v2679_v31, %v2567_v57 }
 0x1da   :  { %3585 = vst [vmem:[#allocation20_spill] sm:$0xff] %v2743_v54  ;;  %v907_v25 = vpop.f32.mrf.mxu0  ;;  %v2826_v28 = vadd.f32 %v2677_v19, %v2567_v57  ;;  %v2844_v31 = vadd.f32 %v2685_v14, %v2569_v17  ;;  %v2863_v14 = vadd.f32 %v901_v42, %v2584_v59 }
 0x1db   :  { %v2753_v50 = vpop.f32.mrf.mxu1  ;;  %v2847_v19 = vadd.f32 %v907_v25, %v2571_v51 }
 0x1dc   :  { %3586 = vst [vmem:[#allocation21_spill] sm:$0xff] %v2753_v50  ;;  %v2755_v34 = vpop.f32.mrf.mxu0 }
 0x1dd   :  { %3587 = vst [vmem:[#allocation22_spill] sm:$0xff] %v2755_v34  ;;  %v2757_v47 = vpop.f32.mrf.mxu1  ;;  %3601 = vst [vmem:[#allocation32_spill] sm:$0xff] %v2847_v19 }
 0x1de   :  { %3588 = vst [vmem:[#allocation23_spill] sm:$0xff] %v2757_v47  ;;  %v911_v13 = vpop.f32.mrf.mxu0  ;;  %v2853_v47 = vadd.f32 %v2671_v55, %v2578_v1 }
 0x1df   :  { %v2773_v56 = vpop.f32.mrf.mxu1  ;;  %v2809_v22 = vadd.f32 %v911_v13, %v2578_v1  ;;  %v2836_v13 = vadd.f32 %v2653_v15, %v2571_v51  ;;  %v2857_v15 = vadd.f32 %v2673_v48, %v2567_v57 }
 0x1e0   :  { %3589 = vst [vmem:[#allocation24_spill] sm:$0xff] %v2773_v56  ;;  %v2779_v35 = vpop.f32.mrf.mxu0  ;;  %v1276_v48 = vmax.f32 %v2853_v47, 0.0 }
 0x1e1   :  { %3590 = vst [vmem:[#allocation25_spill] sm:$0xff] %v2779_v35  ;;  %v2781_v16 = vpop.f32.mrf.mxu1  ;;  %3597 = vst [vmem:[#allocation28_spill] sm:$0xff] %v2809_v22 }
 0x1e2   :  { %3591 = vst [vmem:[#allocation26_spill] sm:$0xff] %v2781_v16  ;;  %v917_v37 = vpop.f32.mrf.mxu0  ;;  %v2799_v16 = vadd.f32 %v777_v11, %v2569_v17  ;;  %v2818_v11 = vadd.f32 %v2669_v53, %v2578_v1  ;;  %v2840_v53 = vadd.f32 %v2651_v5, %v2571_v51  ;;  %v3614_v5 = vmax.f32 %v2844_v31, 0.0 }
 0x1e3   :  { %v2801_v54 = vpop.f32.mrf.mxu1  ;;  %v2812_v38 = vadd.f32 %v917_v37, %v2567_v57 }
 0x1e4   :  { %3596 = vst [vmem:[#allocation27_spill] sm:$0xff] %v2801_v54  ;;  %v2814_v0 = vpop.f32.mrf.mxu0  ;;  %v3608_v42 = vmax.f32 %v2799_v16, 0.0 }
 0x1e5   :  { %3598 = vst [vmem:[#allocation29_spill] sm:$0xff] %v2812_v38  ;;  %3599 = vst [vmem:[#allocation30_spill] sm:$0xff] %v2814_v0  ;;  %v2832_v37 = vpop.f32.mrf.mxu1  ;;  %v1278_v0 = vmax.f32 %v2818_v11, 0.0  ;;  %v1265_v11 = vmax.f32 %v2840_v53, 0.0  ;;  %v3612_v53 = vmax.f32 %v2826_v28, 0.0 }
 0x1e6   :  { %3600 = vst [vmem:[#allocation31_spill] sm:$0xff] %v2832_v37  ;;  %v921_v29 = vpop.f32.mrf.mxu0  ;;  %v2881_v37 = vadd.f32 %v2708_v41, %v2582_v40  ;;  %v1277_v41 = vmax.f32 %v839_v20, 0.0  ;;  %v1264_v20 = vmax.f32 %v2806_v26, 0.0 }
 0x1e7   :  { %v2860_v34 = vpop.f32.mrf.mxu1  ;;  %v2868_v63 = vadd.f32 %v921_v29, %v2569_v17  ;;  %v3610_v29 = vmax.f32 %v2809_v22, 0.0 }
 0x1e8   :  { %3602 = vst [vmem:[#allocation33_spill] sm:$0xff] %v2860_v34  ;;  %v2870_v55 = vpop.f32.mrf.mxu0  ;;  %v3544_v34 = vmax.f32 %v2830_v61, 0.0  ;;  %3606 = vst [vmem:[#allocation37_spill] sm:$0xff] %v2881_v37 }
 0x1e9   :  { %3603 = vst [vmem:[#allocation34_spill] sm:$0xff] %v2868_v63  ;;  %3604 = vst [vmem:[#allocation35_spill] sm:$0xff] %v2870_v55  ;;  %v2876_v54 = vpop.f32.mrf.mxu1  ;;  %v1377_v25 = vmax.f32 %v1278_v0, %v3610_v29  ;;  %v3613_v47 = vmax.f32 %v2868_v63, 0.0  ;;  %v3616_v29 = vmax.f32 %v2857_v15, 0.0  ;;  %v766_v63 = vadd.f32 %v2665_v21, %v2578_v1 }
 0x1ea   :  { %3605 = vst [vmem:[#allocation36_spill] sm:$0xff] %v2876_v54  ;;  %v2885_v55 = vpop.f32.mrf.mxu0  ;;  %v1399_v54 = vmax.f32 %v3608_v42, %v3544_v34  ;;  %v762_v42 = vadd.f32 %v2648_v43, %v2571_v51  ;;  %v1263_v34 = vmax.f32 %v2836_v13, 0.0  ;;  %v3622_v51 = vmax.f32 %v2644_v33, 0.0 }
 0x1eb   :  { %3607 = vst [vmem:[#allocation38_spill] sm:$0xff] %v2885_v55  ;;  %v2894_v35 = vpop.f32.mrf.mxu1  ;;  %v3611_v55 = vmax.f32 %v2812_v38, 0.0  ;;  %v1401_v50 = vmax.f32 %v3614_v5, %v3613_v47  ;;  %v3620_v47 = vmax.f32 %v2847_v19, 0.0  ;;  %v3623_v19 = vmax.f32 %v2863_v14, 0.0 }
 0x1ec   :  { %3609 = vst [vmem:[#allocation39_spill] sm:$0xff] %v2894_v35  ;;  %v2907_v8 = vpop.f32.mrf.mxu0  ;;  %v3617_v35 = vmax.f32 %v2822_v4, 0.0  ;;  %v3624_v21 = vmax.f32 %v2767_v44, 0.0 }
 0x1ed   :  { %v1389_v56 = vmax.f32 %v3612_v53, %v3611_v55  ;;  %3615 = vst [vmem:[#allocation40_spill] sm:$0xff] %v2907_v8  ;;  %v2916_v22 = vpop.f32.mrf.mxu1  ;;  %v3619_v55 = vmax.f32 %v2771_v49, 0.0  ;;  %v1365_v8 = vmax.f32 %v1265_v11, %v3620_v47  ;;  %v1353_v47 = vmax.f32 %v1252_v18, %v3623_v19 }
 0x1ee   :  { %v1387_v38 = vmax.f32 %v3617_v35, %v3616_v29  ;;  %3618 = vst [vmem:[#allocation41_spill] sm:$0xff] %v2916_v22  ;;  %v2925_v43 = vpop.f32.mrf.mxu0  ;;  %v1375_v35 = vmax.f32 %v1276_v48, %v1277_v41  ;;  %v1363_v49 = vmax.f32 %v1263_v34, %v1264_v20 }
 0x1ef   :  { %v2920_v53 = vmax.f32 %v3619_v55, %v1252_v18  ;;  %3621 = vst [vmem:[#allocation42_spill] sm:$0xff] %v2925_v43  ;;  %v1449_v13 = vpack.c.bf16 %v1401_v50, %v1389_v56  ;;  %v2930_v22 = vpop.f32.mrf.mxu1  ;;  %v1351_v5 = vmax.f32 %v3622_v51, %v3619_v55  ;;  %v1437_v50 = vpack.c.bf16 %v1377_v25, %v1365_v8 }
 0x1f0   :  { %v1447_v29 = vpack.c.bf16 %v1399_v54, %v1387_v38  ;;  %v2938_v43 = vpop.f32.mrf.mxu0  ;;  %v3625_v54 = vmax.f32 %v2763_v23, 0.0  ;;  %v772_v51 = vadd.f32 %v2675_v32, %v2567_v57  ;;  %v3627_v38 = vmax.f32 %v2632_v62, 0.0 }
 0x1f1   :  { %1669 = vmatprep.subr.bf16.mxu1 %v1449_v13  ;;  %v2950_v33 = vpop.f32.mrf.mxu1  ;;  %v1262_v25 = vmax.f32 %v762_v42, 0.0  ;;  %v2958_v13 = vmax.f32 %v1277_v41, %v1278_v0  ;;  %v3628_v55 = vmax.f32 %v2881_v37, 0.0  ;;  %v1275_v23 = vmax.f32 %v766_v63, 0.0  ;;  %v3649_v41 = vld [vmem:[#allocation8_spill] sm:$0xff] }
 0x1f2   :  { %v2946_v26 = vmax.f32 %v3625_v54, %v3624_v21  ;;  %1670 = vmatpush3.bf16.msra.mxu1 %v1447_v29  ;;  %v3626_v8 = vmov %v3625_v54  ;;  %v2964_v32 = vpop.f32.mrf.mxu0  ;;  %v2969_v29 = vld [vmem:[%s3515_s5 + $0x10] sm:$0xff]  ;;  %v1435_v56 = vpack.c.bf16 %v1375_v35, %v1363_v49  ;;  %v776_v62 = vadd.f32 %v2683_v58, %v2569_v17  ;;  %s1794_s5 = smov [#allocation2]  }
 0x1f3   :  { %v1339_v19 = vmax.f32 %v3627_v38, %v3626_v8  ;;  %v1341_v54 = vmax.f32 %v3624_v21, %v3628_v55  ;;  %1671 = vmatprep.subr.bf16.mxu1 %v1437_v50  ;;  %v2973_v0 = vpop.f32.mrf.mxu1  ;;  %v2977_v42 = vmax.f32 %v1264_v20, %v1265_v11  ;;  %v3629_v50 = vmax.f32 %v2702_v52, 0.0  ;;  %s1615_s2 = sshll.u32 %s1794_s5, 4  ;;  %s1616_s2 = int_to_ptr.vmem [resolvable:$true] %s1615_s2 }
 0x1f4   :  { %v3630_v8 = vmax.f32 %v2751_v46, 0.0  ;;  %v2983_v55 = vpop.f32.mrf.mxu0  ;;  %v2985_v35 = vmax.f32 %v1262_v25, %v1263_v34  ;;  %v2987_v49 = vmax.f32 %v1275_v23, %v1276_v48  ;;  %v1288_v58 = vmax.f32 %v772_v51, 0.0  ;;  %s1770_s24 = scalar_lea.vmem %s1616_s2, 128  ;;  %p1775_p1 = scmp.lt.s32.totalorder %s1616_s2, %s1616_s2 }
 0x1f5   :  { %v1423_v44 = vpack.c.bf16 %v1351_v5, %v1339_v19  ;;  %v1425_v63 = vpack.c.bf16 %v1353_v47, %v1341_v54  ;;  %v2989_v21 = vpop.f32.mrf.mxu1  ;;  %v3631_v5 = vmax.f32 %v2844_v31, 0.0  ;;  %v3632_v52 = vmax.f32 %v2830_v61, 0.0  ;;  %p1771_p0 = scmp.ne.s32.totalorder %s1616_s2, %s1770_s24  ;;  %p1776_p2 = scmp.lt.s32.totalorder %s1770_s24, %s1770_s24 }
 0x1f6   :  { %v1329_v38 = vmax.f32 %v3630_v8, %v3629_v50  ;;  %1672 = vmatpush3.bf16.msra.mxu1 %v1435_v56  ;;  %v3633_v20 = vmax.f32 %v2694_v12, 0.0  ;;  %v3634_v47 = vmax.f32 %v2747_v6, 0.0  ;;  %v3003_v48 = vadd.f32 %v2741_v39, %v2584_v59  ;;  %v3005_v56 = vpop.f32.mrf.mxu0 }
 0x1f7   :  { %v1400_v46 = vmax.f32 %v3632_v52, %v3631_v5  ;;  %1673 = vmatprep.subr.bf16.mxu1 %v1425_v63  ;;  %v1301_v19 = vmax.f32 %v776_v62, 0.0  ;;  %v3011_v61 = vadd.f32 %v2699_v60, %v2591_v3  ;;  %v3015_v12 = vadd.f32 %v2715_v9, %v2582_v40  ;;  %v3021_v39 = vpop.f32.mrf.mxu1  ;;  %v3642_v5 = vld [vmem:[#allocation21_spill] sm:$0xff]  ;;  %v3643_v52 = vld [vmem:[#allocation24_spill] sm:$0xff]  ;;  %p1777_p3 = por %p1776_p2, %p1775_p1 }
 0x1f8   :  { %v1317_v34 = vmax.f32 %v3634_v47, %v3633_v20  ;;  %v3019_v6 = vadd.f32 %v2713_v30, %v2582_v40  ;;  %v3636_v31 = vmax.f32 %v2822_v4, 0.0  ;;  %v3637_v54 = vmax.f32 %v2826_v28, 0.0  ;;  %v3031_v50 = vpop.f32.mrf.mxu0  ;;  %v3640_v28 = vld [vmem:[#allocation19_spill] sm:$0xff] }
 0x1f9   :  { %3635 = vst [vmem:[#allocation43_spill] sm:$0xff] %v3015_v12  ;;  %v3638_v23 = vmax.f32 %v2857_v15, 0.0  ;;  %v975_v60 = vadd.f32 %v2733_v45, %v2584_v59  ;;  %v3639_v8 = vmax.f32 %v2799_v16, 0.0  ;;  %v3037_v63 = vadd.f32 %v2687_v7, %v2586_v27  ;;  %p1778_p4 = pnand %p1777_p3, %p1771_p0 }
 0x1fa   :  { %v1386_v25 = vmax.f32 %v1288_v58, %v3636_v31  ;;  %v1413_v9 = vpack.c.bf16 %v1329_v38, %v1317_v34  ;;  %v971_v4 = vadd.f32 %v2705_v2, %v2582_v40  ;;  %v3043_v15 = vadd.f32 %v3640_v28, %v2584_v59  ;;  %1674 = vmatpush3.bf16.msra.mxu1 %v1423_v44  ;;  %v3045_v58 = vpop.f32.mrf.mxu1  ;;  %v3641_v38 = vld [vmem:[#allocation5_spill] sm:$0xff]  ;;  %v1053_v20 = vpop.f32.mrf.mxu0  ;;  %v3646_v28 = vld [vmem:[#allocation22_spill] sm:$0xff] }
 0x1fb   :  { %v1388_v62 = vmax.f32 %v3638_v23, %v3637_v54  ;;  %v1398_v30 = vmax.f32 %v1301_v19, %v3639_v8  ;;  %v1254_v45 = vmax.f32 %v3003_v48, 0.0  ;;  %v3050_v16 = vadd.f32 %v3642_v5, %v3641_v38  ;;  %v3644_v19 = vld [vmem:[#allocation25_spill] sm:$0xff]  ;;  %v3645_v23 = vld [vmem:[#allocation20_spill] sm:$0xff] }
 0x1fc   :  { %v3054_v7 = vadd.f32 %v3643_v52, %v2578_v1  ;;  %1675 = vmatprep.subr.bf16.mxu1 %v1413_v9  ;;  %v914_v48 = vadd.f32 %v3644_v19, %v2578_v1  ;;  %v3061_v31 = vpop.f32.mrf.mxu1  ;;  %v1255_v54 = vmax.f32 %v975_v60, 0.0  ;;  %v981_v8 = vadd.f32 %v3645_v23, %v3641_v38  ;;  %v3069_v5 = vpop.f32.mrf.mxu0  ;;  %v3648_v60 = vld [vmem:[#allocation10_spill] sm:$0xff] }
 0x1fd   :  { %v1448_v2 = vpack.c.bf16 %v1400_v46, %v1388_v62  ;;  %v910_v9 = vadd.f32 %v3646_v28, %v3641_v38  ;;  %v3647_v46 = vld [vmem:[#allocation23_spill] sm:$0xff]  ;;  %v1434_v52 = vpack.c.bf16 %v2987_v49, %v2985_v35  ;;  %v1242_v19 = vmax.f32 %v971_v4, 0.0  ;;  %v3654_v49 = vld [vmem:[#allocation14_spill] sm:$0xff] }
 0x1fe   :  { %v985_v62 = vadd.f32 %v3647_v46, %v2578_v1  ;;  %v3650_v51 = vpack.c.bf16 %v3648_v60, %v3649_v41  ;;  %v1446_v23 = vpack.c.bf16 %v1398_v30, %v1386_v25  ;;  %v3078_v34 = vmax.f32 %v1254_v45, %v1255_v54  ;;  %v1057_v44 = vpop.f32.mrf.mxu0  ;;  %v3082_v47 = vpop.f32.mrf.mxu1  ;;  %v3659_v30 = vld [vmem:[#allocation27_spill] sm:$0xff] }
 0x1ff   :  { %3652 = vst [vmem:[#allocation5_spill] sm:$0xff] %v3082_v47  ;;  %v3653_v35 = vmax.f32 %v3011_v61, 0.0  ;;  %v3655_v4 = vmax.f32 %v3654_v49, 0.0  ;;  %v3657_v41 = vmax.f32 %v3019_v6, 0.0  ;;  %v1280_v25 = vmax.f32 %v914_v48, 0.0 }
 0x200   :  { %1676 = vmatpush3.bf16.msra.mxu1 %v3650_v51  ;;  %3651 = vst [vmem:[#allocation19_spill] sm:$0xff] %v3078_v34  ;;  %v3096_v60 = vadd.f32 %v3659_v30, %v2567_v57  ;;  %v1268_v28 = vmax.f32 %v981_v8, 0.0  ;;  %v1267_v18 = vmax.f32 %v910_v9, 0.0  ;;  %v1281_v37 = vmax.f32 %v985_v62, 0.0  ;;  %v3102_v47 = vpop.f32.mrf.mxu0 }
 0x201   :  { %1677 = vmatprep.subr.bf16.mxu1 %v1448_v2  ;;  %v3088_v11 = vmax.f32 %v3655_v4, %v3653_v35  ;;  %v3092_v51 = vmax.f32 %v1242_v19, %v3657_v41  ;;  %v3660_v2 = vmax.f32 %v3015_v12, 0.0  ;;  %v3662_v35 = vmax.f32 %v3043_v15, 0.0  ;;  %v3664_v4 = vld [vmem:[#allocation26_spill] sm:$0xff]  ;;  %v3665_v41 = vld [vmem:[#allocation35_spill] sm:$0xff] }
 0x202   :  { %v991_v48 = vadd.f32 %v3664_v4, %v2567_v57  ;;  %v924_v30 = vadd.f32 %v3665_v41, %v2569_v17  ;;  %v3667_v8 = vmax.f32 %v2863_v14, 0.0  ;;  %v3128_v4 = vpop.f32.mrf.mxu1  ;;  %v1063_v14 = vpop.f32.mrf.mxu0 }
 0x203   :  { %3656 = vst [vmem:[#allocation21_spill] sm:$0xff] %v3088_v11  ;;  %3658 = vst [vmem:[#allocation24_spill] sm:$0xff] %v3092_v51  ;;  %v3100_v46 = vmax.f32 %v3660_v2, %v1242_v19  ;;  %v3106_v49 = vmax.f32 %v1255_v54, %v3662_v35  ;;  %v3666_v11 = vld [vmem:[#allocation33_spill] sm:$0xff]  ;;  %v3669_v54 = vmax.f32 %v3050_v16, 0.0  ;;  %v3671_v2 = vmax.f32 %v3054_v7, 0.0 }
 0x204   :  { %v997_v12 = vadd.f32 %v3666_v11, %v2569_v17  ;;  %1678 = vmatpush3.bf16.msra.mxu1 %v1446_v23  ;;  %v3116_v9 = vmax.f32 %v3667_v8, %v1254_v45  ;;  %v3673_v11 = vpack.c.bf16 %v2958_v13, %v2977_v42  ;;  %v3133_v45 = vmax.f32 %v1280_v25, %v1281_v37  ;;  %v3674_v23 = vld [vmem:[#allocation30_spill] sm:$0xff]  ;;  %v3152_v42 = vpop.f32.mrf.mxu0 }
 0x205   :  { %3661 = vst [vmem:[#allocation25_spill] sm:$0xff] %v3100_v46  ;;  %3663 = vst [vmem:[#allocation20_spill] sm:$0xff] %v3106_v49  ;;  %v3122_v19 = vmax.f32 %v1268_v28, %v3669_v54  ;;  %v3126_v35 = vmax.f32 %v1281_v37, %v3671_v2  ;;  %v920_v41 = vadd.f32 %v3674_v23, %v2567_v57  ;;  %v1295_v8 = vmax.f32 %v3096_v60, 0.0  ;;  %v3675_v54 = vld [vmem:[#allocation31_spill] sm:$0xff]  ;;  %v3680_v46 = vld [vmem:[#allocation38_spill] sm:$0xff] }
 0x206   :  { %3668 = vst [vmem:[#allocation22_spill] sm:$0xff] %v3116_v9  ;;  %1679 = vmatprep.subr.bf16.mxu1 %v3673_v11  ;;  %v995_v62 = vadd.f32 %v3675_v54, %v2569_v17  ;;  %v3676_v9 = vld [vmem:[#allocation32_spill] sm:$0xff]  ;;  %v3144_v51 = vmax.f32 %v1267_v18, %v1268_v28  ;;  %v3147_v13 = vadd.f32 %v1057_v44, %v2578_v1  ;;  %v1294_v11 = vmax.f32 %v991_v48, 0.0  ;;  %v3685_v44 = vld [vmem:[#allocation42_spill] sm:$0xff] }
 0x207   :  { %3670 = vst [vmem:[#allocation23_spill] sm:$0xff] %v3122_v19  ;;  %3672 = vst [vmem:[#allocation10_spill] sm:$0xff] %v3126_v35  ;;  %v3677_v2 = vmax.f32 %v3676_v9, 0.0  ;;  %v3150_v37 = vadd.f32 %v1063_v14, %v2567_v57  ;;  %v1306_v23 = vmax.f32 %v924_v30, 0.0  ;;  %v1308_v60 = vmax.f32 %v997_v12, 0.0  ;;  %v3682_v9 = vld [vmem:[#allocation28_spill] sm:$0xff] }
 0x208   :  { %3679 = vst [vmem:[#allocation14_spill] sm:$0xff] %v3147_v13  ;;  %v3156_v54 = vadd.f32 %v3680_v46, %v2586_v27  ;;  %1680 = vmatpush3.bf16.msra.mxu1 %v1434_v52  ;;  %v3164_v28 = vadd.f32 %v3685_v44, %v2591_v3  ;;  %v3167_v14 = vadd.f32 %v1053_v20, %v3641_v38  ;;  %v1067_v46 = vpop.f32.mrf.mxu0  ;;  %v1293_v48 = vmax.f32 %v920_v41, 0.0  ;;  %v3689_v19 = vld [vmem:[#allocation12_spill] sm:$0xff] }
 0x209   :  { %v3142_v49 = vmax.f32 %v3677_v2, %v1267_v18  ;;  %v3683_v2 = vmax.f32 %v3682_v9, 0.0  ;;  %v3686_v12 = vpack.c.bf16 %v2920_v53, %v2946_v26  ;;  %v3178_v30 = vmax.f32 %v1294_v11, %v1295_v8  ;;  %v3698_v53 = vld [vmem:[#allocation39_spill] sm:$0xff] }
 0x20a   :  { %3681 = vst [vmem:[#allocation27_spill] sm:$0xff] %v3156_v54  ;;  %v1307_v9 = vmax.f32 %v995_v62, 0.0  ;;  %v3182_v20 = vadd.f32 %v3005_v56, %v2584_v59  ;;  %v3187_v26 = vadd.f32 %v1067_v46, %v2569_v17  ;;  %v1069_v44 = vpop.f32.mrf.mxu0  ;;  %v3690_v56 = vld [vmem:[#allocation11_spill] sm:$0xff]  ;;  %v3202_v46 = vadd.f32 %v2964_v32, %v2582_v40  ;;  %v3694_v62 = vld [vmem:[#allocation29_spill] sm:$0xff] }
 0x20b   :  { %3678 = vst [vmem:[#allocation8_spill] sm:$0xff] %v3142_v49  ;;  %v3160_v18 = vmax.f32 %v3683_v2, %v1280_v25  ;;  %v3169_v49 = vpop.f32.mrf.mxu1  ;;  %1681 = vmatprep.subr.bf16.mxu1 %v3686_v12  ;;  %v3687_v12 = vld [vmem:[#allocation34_spill] sm:$0xff]  ;;  %v3691_v35 = vpack.c.bf16 %v3689_v19, %v3690_v56  ;;  %v3695_v19 = vmax.f32 %v3694_v62, 0.0  ;;  %v1391_v56 = vmax.f32 %v1293_v48, %v1294_v11  ;;  %v3696_v2 = vld [vmem:[#allocation40_spill] sm:$0xff] }
 0x20c   :  { %v3688_v52 = vmax.f32 %v3687_v12, 0.0  ;;  %v1403_v41 = vmax.f32 %v1306_v23, %v1307_v9  ;;  %v3193_v25 = vmax.f32 %v1307_v9, %v1308_v60  ;;  %v3209_v9 = vpop.f32.mrf.mxu0  ;;  %v3217_v32 = vadd.f32 %v3696_v2, %v2586_v27 }
 0x20d   :  { %3684 = vst [vmem:[#allocation26_spill] sm:$0xff] %v3160_v18  ;;  %1682 = vmatpush3.bf16.msra.mxu1 %v3691_v35  ;;  %v1138_v12 = vpop.f32.mrf.mxu1  ;;  %3693 = vst [vmem:[#allocation35_spill] sm:$0xff] %v3209_v9  ;;  %v3213_v35 = vmax.f32 %v3695_v19, %v1293_v48  ;;  %v3221_v34 = vadd.f32 %v3698_v53, %v2586_v27  ;;  %v3701_v62 = vmax.f32 %v3150_v37, 0.0  ;;  %v3702_v11 = vmax.f32 %v3187_v26, 0.0 }
 0x20e   :  { %v3191_v18 = vmax.f32 %v3688_v52, %v1306_v23  ;;  %v3692_v23 = vpack.c.bf16 %v2793_v36, %v2787_v24  ;;  %3697 = vst [vmem:[#allocation33_spill] sm:$0xff] %v3217_v32  ;;  %v3699_v36 = vmax.f32 %v3147_v13, 0.0  ;;  %v3700_v24 = vmax.f32 %v3054_v7, 0.0  ;;  %v3232_v9 = vpop.f32.mrf.mxu0  ;;  %v3705_v7 = vld [vmem:[#allocation9_spill] sm:$0xff] }
 0x20f   :  { %v1393_v19 = vmax.f32 %v1295_v8, %v3701_v62  ;;  %v1405_v48 = vmax.f32 %v1308_v60, %v3702_v11  ;;  %v1451_v53 = vpack.c.bf16 %v1403_v41, %v1391_v56  ;;  %v3703_v32 = vmax.f32 %v3156_v54, 0.0  ;;  %v1140_v2 = vpop.f32.mrf.mxu1 }
 0x210   :  { %1683 = vmatprep.subr.bf16.mxu1 %v3692_v23  ;;  %v1381_v23 = vmax.f32 %v3700_v24, %v3699_v36  ;;  %v3704_v52 = vmax.f32 %v3037_v63, 0.0  ;;  %v3706_v36 = vld [vmem:[#allocation7_spill] sm:$0xff]  ;;  %v1452_v8 = vpack.c.bf16 %v3193_v25, %v3178_v30  ;;  %v3708_v60 = vmax.f32 %v3164_v28, 0.0  ;;  %v1746_v54 = vpop.f32.mrf.mxu0  ;;  %v3727_v30 = vld [vmem:[#allocation36_spill] sm:$0xff] }
 0x211   :  { %v3707_v24 = vpack.c.bf16 %v3705_v7, %v3706_v36  ;;  %v3709_v62 = vmax.f32 %v3011_v61, 0.0  ;;  %v3559_v41 = vmax.f32 %v3202_v46, 0.0  ;;  %v3710_v56 = vmax.f32 %v3167_v14, 0.0 }
 0x212   :  { %v3240_v13 = vmax.f32 %v3704_v52, %v3703_v32  ;;  %v3711_v52 = vmax.f32 %v3050_v16, 0.0  ;;  %v1453_v7 = vpack.c.bf16 %v1405_v48, %v1393_v19  ;;  %v3260_v36 = vadd.f32 %v2938_v43, %v2591_v3 }
 0x213   :  { %1684 = vmatpush3.bf16.msra.mxu1 %v3707_v24  ;;  %v3251_v11 = vmax.f32 %v3709_v62, %v3708_v60  ;;  %v3264_v24 = vadd.f32 %v2930_v22, %v2591_v3  ;;  %v3268_v61 = vadd.f32 %v2950_v33, %v2582_v40  ;;  %v3272_v60 = vadd.f32 %v3021_v39, %v2584_v59  ;;  %v1182_v33 = vpop.f32.mrf.mxu0 }
 0x214   :  { %v1369_v32 = vmax.f32 %v3711_v52, %v3710_v56  ;;  %v3276_v16 = vadd.f32 %v2973_v0, %v2582_v40  ;;  %v3712_v19 = vmax.f32 %v3182_v20, 0.0  ;;  %v3713_v43 = vmax.f32 %v3043_v15, 0.0  ;;  %1691 = vmatprep.subr.bf16.mxu0 %v1453_v7  ;;  %v1142_v52 = vpop.f32.mrf.mxu1 }
 0x215   :  { %v3714_v22 = vcombine.low %v2576_v10, %v2576_v10  ;;  %v3287_v39 = vadd.f32 %v2983_v55, %v2582_v40  ;;  %v3291_v0 = vadd.f32 %v2989_v21, %v2584_v59  ;;  %v3295_v56 = vadd.f32 %v3061_v31, %v3641_v38  ;;  %1692 = vmatpush3.bf16.msra.mxu0 %v1451_v53  ;;  %v1749_v31 = vpop.f32.mrf.mxu0 }
 0x216   :  { %v1357_v48 = vmax.f32 %v3713_v43, %v3712_v19  ;;  %v1441_v62 = vpack.c.bf16 %v1381_v23, %v1369_v32  ;;  %v3715_v10 = vcombine.high %v2969_v29, %v2969_v29  ;;  %v3716_v15 = vmax.f32 %v3019_v6, 0.0 }
 0x217   :  { %1521 = vmatmul.mubr.bf16.vlgmr.msra.gmra.mxu1 %v3714_v22  ;;  %v3306_v55 = vadd.f32 %v3031_v50, %v2584_v59  ;;  %v3309_v21 = vadd.f32 %v1069_v44, %v2569_v17  ;;  %v1417_v53 = vpack.c.bf16 %v3251_v11, %v3240_v13  ;;  %v1260_v32 = vmax.f32 %v3272_v60, 0.0  ;;  %v1195_v11 = vpop.f32.mrf.mxu0 }
 0x218   :  { %1600 = vmatprep.mubr.bf16.mxu1 %v3715_v10  ;;  %v1345_v23 = vmax.f32 %v3716_v15, %v3559_v41  ;;  %1693 = vmatprep.subr.bf16.mxu0 %v1441_v62  ;;  %v3316_v7 = vadd.f32 %v3045_v58, %v3641_v38  ;;  %v3320_v6 = vadd.f32 %v3128_v4, %v2578_v1  ;;  %v1273_v4 = vmax.f32 %v3295_v56, 0.0 }
 0x219   :  { %v1204_v50 = vadd.f32 %v1749_v31, %v2567_v57  ;;  %v3325_v44 = vadd.f32 %v3152_v42, %v2567_v57  ;;  %v3328_v19 = vadd.f32 %v1138_v12, %v2567_v57  ;;  %v3331_v13 = vadd.f32 %v1140_v2, %v2569_v17  ;;  %v3718_v2 = vld [vmem:[#allocation5_spill] sm:$0xff] }
 0x21a   :  { %v1429_v43 = vpack.c.bf16 %v1357_v48, %v1345_v23  ;;  %v3335_v58 = vadd.f32 %v3069_v5, %v3641_v38  ;;  %v3339_v22 = vadd.f32 %v1142_v52, %v2569_v17  ;;  %v1196_v42 = vadd.f32 %v1195_v11, %v3641_v38  ;;  %v1750_v38 = vpop.f32.mrf.mxu0 }
 0x21b   :  { %v3717_v12 = vpack.c.bf16 %v3133_v45, %v3144_v51  ;;  %v3347_v62 = vadd.f32 %v3718_v2, %v2578_v1  ;;  %v3351_v48 = vadd.f32 %v3102_v47, %v2578_v1  ;;  %v3355_v5 = vadd.f32 %v3169_v49, %v2567_v57  ;;  %v3719_v57 = vld [vmem:[#allocation35_spill] sm:$0xff] }
 0x21c   :  { %v3560_v10 = vmax.f32 %v3309_v21, 0.0  ;;  %v1286_v15 = vmax.f32 %v3320_v6, 0.0  ;;  %v1191_v51 = vadd.f32 %v1746_v54, %v2584_v59  ;;  %v1300_v45 = vmax.f32 %v1204_v50, 0.0  ;;  %v1198_v11 = vpop.f32.mrf.mxu0  ;;  %v3720_v59 = vld [vmem:[#allocation19_spill] sm:$0xff]  ;;  %v3721_v54 = vld [vmem:[#allocation25_spill] sm:$0xff]  ;;  %v3756_v6 = vld [vmem:[#allocation14_spill] sm:$0xff] }
 0x21d   :  { %1694 = vmatpush3.bf16.msra.mxu0 %v3717_v12  ;;  %v1207_v23 = vadd.f32 %v1750_v38, %v2569_v17  ;;  %v1297_v52 = vmax.f32 %v3325_v44, 0.0  ;;  %v3561_v47 = vmax.f32 %v3328_v19, 0.0  ;;  %v3562_v31 = vmax.f32 %v3331_v13, 0.0 }
 0x21e   :  { %1695 = vmatprep.subr.bf16.mxu0 %v1429_v43  ;;  %v1188_v49 = vadd.f32 %v3719_v57, %v2582_v40  ;;  %v3563_v43 = vmax.f32 %v3339_v22, 0.0  ;;  %v1274_v12 = vmax.f32 %v1196_v42, 0.0  ;;  %v1199_v41 = vadd.f32 %v1198_v11, %v2578_v1 }
 0x21f   :  { %v1313_v2 = vmax.f32 %v1207_v23, 0.0  ;;  %v3722_v50 = vpack.c.bf16 %v3720_v59, %v3721_v54  ;;  %v1284_v17 = vmax.f32 %v3351_v48, 0.0  ;;  %v1298_v38 = vmax.f32 %v3355_v5, 0.0 }
 0x220   :  { %v1407_v40 = vmax.f32 %v3560_v10, %v3562_v31  ;;  %v1183_v57 = vadd.f32 %v1182_v33, %v2591_v3  ;;  %v1261_v42 = vmax.f32 %v1191_v51, 0.0  ;;  %v1397_v1 = vmax.f32 %v3561_v47, %v1300_v45  ;;  %v3724_v45 = vld [vmem:[#allocation16_spill] sm:$0xff] }
 0x221   :  { %1696 = vmatpush3.bf16.msra.mxu0 %v3722_v50  ;;  %v1409_v23 = vmax.f32 %v3563_v43, %v1313_v2  ;;  %v1287_v11 = vmax.f32 %v1199_v41, 0.0  ;;  %v1271_v59 = vmax.f32 %v3335_v58, 0.0  ;;  %v1285_v54 = vmax.f32 %v3347_v62, 0.0  ;;  %v3723_v41 = vld [vmem:[#allocation18_spill] sm:$0xff] }
 0x222   :  { %1697 = vmatprep.subr.bf16.mxu0 %v1417_v53  ;;  %v1395_v50 = vmax.f32 %v1297_v52, %v1298_v38  ;;  %v1248_v10 = vmax.f32 %v1188_v49, 0.0  ;;  %v1180_v33 = vadd.f32 %v3232_v9, %v2586_v27  ;;  %v1373_v53 = vmax.f32 %v1273_v4, %v1274_v12 }
 0x223   :  { %v1385_v51 = vmax.f32 %v1286_v15, %v1287_v11  ;;  %v3725_v2 = vpack.c.bf16 %v3723_v41, %v3724_v45  ;;  %v1457_v47 = vpack.c.bf16 %v1409_v23, %v1397_v1  ;;  %v3564_v31 = vmax.f32 %v3306_v55, 0.0 }
 0x224   :  { %v1272_v43 = vmax.f32 %v3316_v7, 0.0  ;;  %v1383_v9 = vmax.f32 %v1284_v17, %v1285_v54  ;;  %v1455_v49 = vpack.c.bf16 %v1407_v40, %v1395_v50  ;;  %v1247_v12 = vmax.f32 %v3276_v16, 0.0  ;;  %v3726_v7 = vld [vmem:[#allocation41_spill] sm:$0xff] }
 0x225   :  { %1698 = vmatpush3.bf16.msra.mxu0 %v3725_v2  ;;  %v1361_v11 = vmax.f32 %v1260_v32, %v1261_v42  ;;  %v1235_v1 = vmax.f32 %v1183_v57, 0.0  ;;  %1713 = vmatprep.subr.bf16.mxu1 %v1457_v47  ;;  %v1445_v23 = vpack.c.bf16 %v1385_v51, %v1373_v53  ;;  %v3411_v41 = vadd.f32 %v3726_v7, %v2591_v3  ;;  %v3729_v51 = vld [vmem:[#allocation10_spill] sm:$0xff]  ;;  %v3730_v2 = vld [vmem:[#allocation23_spill] sm:$0xff] }
 0x226   :  { %1699 = vmatprep.subr.bf16.mxu0 %v1452_v8  ;;  %v3565_v45 = vmax.f32 %v3287_v39, 0.0  ;;  %v1259_v40 = vmax.f32 %v3291_v0, 0.0  ;;  %v1371_v25 = vmax.f32 %v1271_v59, %v1272_v43  ;;  %1714 = vmatpush3.bf16.msra.mxu1 %v1455_v49  ;;  %v3419_v8 = vadd.f32 %v3727_v30, %v2586_v27  ;;  %v3732_v49 = vld [vmem:[#allocation8_spill] sm:$0xff] }
 0x227   :  { %v1234_v57 = vmax.f32 %v3264_v24, 0.0  ;;  %v1349_v47 = vmax.f32 %v1247_v12, %v1248_v10  ;;  %v1222_v42 = vmax.f32 %v1180_v33, 0.0  ;;  %v3728_v3 = vpack.c.bf16 %v3191_v18, %v3213_v35  ;;  %1715 = vmatprep.subr.bf16.mxu1 %v1445_v23  ;;  %v3733_v10 = vld [vmem:[#allocation26_spill] sm:$0xff]  ;;  %v3734_v23 = vld [vmem:[#allocation33_spill] sm:$0xff] }
 0x228   :  { %v1232_v0 = vmax.f32 %v3260_v36, 0.0  ;;  %v1246_v50 = vmax.f32 %v3268_v61, 0.0  ;;  %v1359_v53 = vmax.f32 %v3564_v31, %v1259_v40  ;;  %v1443_v27 = vpack.c.bf16 %v1383_v9, %v1371_v25  ;;  %v3735_v9 = vld [vmem:[#allocation24_spill] sm:$0xff] }
 0x229   :  { %1700 = vmatpush3.bf16.msra.mxu0 %v3728_v3  ;;  %v3731_v24 = vpack.c.bf16 %v3729_v51, %v3730_v2  ;;  %v1438_v33 = vpack.c.bf16 %v3733_v10, %v3732_v49  ;;  %v1221_v7 = vmax.f32 %v3221_v34, 0.0  ;;  %v1337_v18 = vmax.f32 %v1234_v57, %v1235_v1  ;;  %v3736_v25 = vld [vmem:[#allocation20_spill] sm:$0xff]  ;;  %v3737_v51 = vld [vmem:[#allocation43_spill] sm:$0xff] }
 0x22a   :  { %v1433_v35 = vpack.c.bf16 %v1361_v11, %v1349_v47  ;;  %v1219_v30 = vmax.f32 %v3734_v23, 0.0  ;;  %v1233_v36 = vmax.f32 %v3411_v41, 0.0  ;;  %v1347_v61 = vmax.f32 %v3565_v45, %v1246_v50  ;;  %1716 = vmatpush3.bf16.msra.mxu1 %v1443_v27  ;;  %v3742_v11 = vld [vmem:[#allocation13_spill] sm:$0xff]  ;;  %v3744_v45 = vld [vmem:[#allocation22_spill] sm:$0xff] }
 0x22b   :  { %1701 = vmatprep.subr.bf16.mxu0 %v3731_v24  ;;  %v1428_v3 = vpack.c.bf16 %v3736_v25, %v3735_v9  ;;  %v3738_v2 = vmax.f32 %v3737_v51, 0.0  ;;  %v3739_v24 = vld [vmem:[#allocation37_spill] sm:$0xff]  ;;  %v1325_v10 = vmax.f32 %v1221_v7, %v1222_v42  ;;  %v3741_v34 = vmax.f32 %v3037_v63, 0.0 }
 0x22c   :  { %v3740_v31 = vmax.f32 %v3739_v24, 0.0  ;;  %1717 = vmatprep.subr.bf16.mxu1 %v1433_v35  ;;  %v3743_v1 = vmax.f32 %v3742_v11, 0.0  ;;  %v1220_v47 = vmax.f32 %v3419_v8, 0.0  ;;  %v1335_v23 = vmax.f32 %v1232_v0, %v1233_v36  ;;  %v3747_v35 = vld [vmem:[#allocation21_spill] sm:$0xff]  ;;  %v3754_v24 = vld [vmem:[#allocation15_spill] sm:$0xff] }
 0x22d   :  { %1702 = vmatpush3.bf16.msra.mxu0 %v1438_v33  ;;  %v1431_v27 = vpack.c.bf16 %v1359_v53, %v1347_v61  ;;  %v3745_v25 = vmax.f32 %v3339_v22, 0.0  ;;  %v3746_v51 = vmax.f32 %v3331_v13, 0.0  ;;  %v1421_v42 = vpack.c.bf16 %v1337_v18, %v1325_v10 }
 0x22e   :  { %v1342_v49 = vmax.f32 %v3740_v31, %v3738_v2  ;;  %v1320_v41 = vmax.f32 %v3743_v1, %v3741_v34  ;;  %1703 = vmatprep.subr.bf16.mxu0 %v1428_v3  ;;  %v1323_v33 = vmax.f32 %v1219_v30, %v1220_v47  ;;  %v3748_v2 = vmax.f32 %v3328_v19, 0.0 }
 0x22f   :  { %v1408_v31 = vmax.f32 %v3746_v51, %v3745_v25  ;;  %1718 = vmatpush3.bf16.msra.mxu1 %v1431_v27  ;;  %v3750_v22 = vmax.f32 %v3187_v26, 0.0  ;;  %v1384_v13 = vmax.f32 %v1285_v54, %v1286_v15  ;;  %v3751_v19 = vmax.f32 %v3150_v37, 0.0 }
 0x230   :  { %v1426_v9 = vpack.c.bf16 %v3744_v45, %v1342_v49  ;;  %v1416_v63 = vpack.c.bf16 %v3747_v35, %v1320_v41  ;;  %v1396_v8 = vmax.f32 %v1298_v38, %v3748_v2  ;;  %1719 = vmatprep.subr.bf16.mxu1 %v1421_v42  ;;  %v1419_v53 = vpack.c.bf16 %v1335_v23, %v1323_v33  ;;  %v3752_v38 = vld [vmem:[#allocation6_spill] sm:$0xff] }
 0x231   :  { %v3749_v45 = vmax.f32 %v3309_v21, 0.0  ;;  %v1394_v5 = vmax.f32 %v3751_v19, %v1297_v52  ;;  %v1657_v3 = vcombine.low %v3752_v38, %v3752_v38  ;;  %v1372_v26 = vmax.f32 %v1272_v43, %v1273_v4  ;;  %v3753_v21 = vld [vmem:[#allocation17_spill] sm:$0xff] }
 0x232   :  { %1704 = vmatpush3.bf16.msra.mxu0 %v1426_v9  ;;  %v1456_v18 = vpack.c.bf16 %v1408_v31, %v1396_v8  ;;  %v3755_v49 = vpack.c.bf16 %v3753_v21, %v3754_v24  ;;  %v3757_v62 = vmax.f32 %v3756_v6, 0.0  ;;  %v1360_v37 = vmax.f32 %v1259_v40, %v1260_v32  ;;  %v1465_v9 = vpop.permute.xlu1 %1464 }
 0x233   :  { %v1406_v61 = vmax.f32 %v3750_v22, %v3749_v45  ;;  %1705 = vmatprep.subr.bf16.mxu0 %v1416_v63  ;;  %1720 = vmatpush3.bf16.msra.mxu1 %v1419_v53  ;;  %v1444_v52 = vpack.c.bf16 %v1384_v13, %v1372_v26  ;;  %v3758_v56 = vmax.f32 %v3167_v14, 0.0  ;;  %v1348_v43 = vmax.f32 %v1246_v50, %v1247_v12 }
 0x234   :  { %1721 = vmatprep.subr.bf16.mxu1 %v1456_v18  ;;  %v1382_v44 = vmax.f32 %v3757_v62, %v1284_v17  ;;  %v3759_v48 = vmax.f32 %v3306_v55, 0.0  ;;  %v3760_v17 = vmax.f32 %v3182_v20, 0.0  ;;  %v1336_v60 = vmax.f32 %v1233_v36, %v1234_v57  ;;  %v3764_v55 = vld [vmem:[#allocation27_spill] sm:$0xff] }
 0x235   :  { %v1454_v15 = vpack.c.bf16 %v1406_v61, %v1394_v5  ;;  %v1370_v4 = vmax.f32 %v3758_v56, %v1271_v59  ;;  %v1432_v32 = vpack.c.bf16 %v1360_v37, %v1348_v43  ;;  %v3761_v40 = vmax.f32 %v3287_v39, 0.0 }
 0x236   :  { %1706 = vmatpush3.bf16.msra.mxu0 %v3755_v49  ;;  %v1358_v54 = vmax.f32 %v3760_v17, %v3759_v48  ;;  %v3762_v58 = vmax.f32 %v3202_v46, 0.0  ;;  %v1324_v59 = vmax.f32 %v1220_v47, %v1221_v7  ;;  %v3763_v16 = vmax.f32 %v3164_v28, 0.0 }
 0x237   :  { %1722 = vmatpush3.bf16.msra.mxu1 %v1454_v15  ;;  %v1442_v10 = vpack.c.bf16 %v1382_v44, %v1370_v4  ;;  %v3765_v11 = vmax.f32 %v3764_v55, 0.0  ;;  %v1659_v39 = vcombine.low %v2969_v29, %v2969_v29 }
 0x238   :  { %1723 = vmatprep.subr.bf16.mxu1 %v1444_v52  ;;  %v1346_v14 = vmax.f32 %v3762_v58, %v3761_v40  ;;  %v1334_v12 = vmax.f32 %v3763_v16, %v1232_v0  ;;  %v1420_v34 = vpack.c.bf16 %v1336_v60, %v1324_v59 }
 0x239   :  { %1561 = vmatmul.mubr.bf16.vlgmr.msra.gmra.mxu0 %v1657_v3  ;;  %v1322_v20 = vmax.f32 %v3765_v11, %v1219_v30 }
 0x23a   :  { %v1430_v50 = vpack.c.bf16 %v1358_v54, %v1346_v14 }
 0x23b   :  { %1724 = vmatpush3.bf16.msra.mxu1 %v1442_v10  ;;  %v1418_v57 = vpack.c.bf16 %v1334_v12, %v1322_v20 }
 0x23c   :  { %1725 = vmatprep.subr.bf16.mxu1 %v1432_v32 }
 0x23f   :  { %1726 = vmatpush3.bf16.msra.mxu1 %v1430_v50 }
 0x240   :  { %1727 = vmatprep.subr.bf16.mxu1 %v1420_v34 }
 0x243   :  { %1728 = vmatpush3.bf16.msra.mxu1 %v1418_v57 }
 0x246   :  { %1601 = vmatmul.mubr.bf16.vlgmr.msra.gmra.mxu1 %v1659_v39 }
 0x2d7   :  { %v1685_v46 = vpop.f32.mrf.mxu1 }
 0x2d9   :  { %v1686_v36 = vpop.f32.mrf.mxu1 }
 0x2da   :  { %v1687_v23 = vadd.f32 %v1686_v36, %v1685_v46 }
 0x2db   :  { %v1688_v7 = vpop.f32.mrf.mxu1 }
 0x2dc   :  { %v1523_v25 = vadd.f32 %v1687_v23, %v1465_v9 }
 0x2dd   :  { %v1689_v1 = vpop.f32.mrf.mxu1 }
 0x2f9   :  { %v1707_v41 = vpop.f32.mrf.mxu0 }
 0x2fb   :  { %v1708_v28 = vpop.f32.mrf.mxu0 }
 0x2fc   :  { %v1709_v27 = vadd.f32 %v1708_v28, %v1707_v41 }
 0x2fd   :  { %v1710_v0 = vpop.f32.mrf.mxu0 }
 0x2fe   :  { %v1563_v31 = vadd.f32 %v1709_v27, %v1523_v25 }
 0x2ff   :  { %v1711_v47 = vpop.f32.mrf.mxu0 }
 0x306   :  { %v1729_v30 = vpop.f32.mrf.mxu1 }
 0x308   :  { %v1730_v51 = vpop.f32.mrf.mxu1 }
 0x309   :  { %v1731_v29 = vadd.f32 %v1730_v51, %v1729_v30 }
 0x30a   :  { %v1732_v42 = vpop.f32.mrf.mxu1 }
 0x30b   :  { %v1603_v33 = vadd.f32 %v1731_v29, %v1563_v31 }
 0x30c   :  { %v1733_v35 = vpop.f32.mrf.mxu1 }
 0x30d   :  { %1608 = vst [vmem:[#allocation2] sm:$0xff] %v1603_v33 }
 0x30e   :  { %1781 = shalt.err (!%p1778_p4)
}
 0x30f   :  { %1618 = dma.vmem_to_hbm [thread:$0]  %s1616_s2, 128, %s3517_s7, [#allocation3]  }
 0x310   :  { %1790 = dma.done.wait [#allocation3], 128  }
 0x311   :  { %1791 = vsyncadd [#allocation3], 4294967168 }
 0x312   :  { %1622 = vsyncpa [#allocation3], 1 }

</bundles_post_ra>
